<compile_context>
chip_gen: v7x
topology: tpu7x:2x2x1
jax: 0.10.0
libtpu: 0.0.40
codegen_flags: <defaults>
</compile_context>

<pallas_src>
import functools

import jax
import jax.numpy as jnp
from jax import lax
from jax.experimental import pallas as pl
from jax.experimental.pallas import tpu as pltpu


_NEG_INF = float("-inf")


def _round_up(x, m):
    return (x + m - 1) // m * m


# ---------------------------------------------------------------------------
# Fused SPPF kernel (one grid step == one batch element)
# ---------------------------------------------------------------------------
def _sppf_fused_kernel(col_ref, x_ref, w0_ref, b0_ref, w5_ref, b5_ref,
                       o_ref, pad_ref, *, H, W, pad_l):
    # col_ref: (1, HW) int32         x_ref : (1, C_in, HW) bf16
    # w0_ref : (C_mid, C_in) bf16    b0_ref: (C_mid, 1) f32
    # w5_ref : (C_out, 4*C_mid) bf16 b5_ref: (C_out, 1) f32
    # o_ref  : (1, C_out, HW) f32    pad_ref: (C_mid, pad_l + HW + pad_l) f32
    HW = H * W
    C_mid = w0_ref.shape[0]
    f32 = jnp.float32

    # Border-only -inf fill of the pooling scratch (tiny: 2*pad_l lanes/chan).
    pad_ref[:, :pad_l] = jnp.full((C_mid, pad_l), _NEG_INF, dtype=f32)
    pad_ref[:, pad_l + HW:] = jnp.full((C_mid, pad_l), _NEG_INF, dtype=f32)

    col = col_ref[...]                       # (1, HW) w-coordinate per position

    def silu(a):                             # a: f32; exp + vrcp ride the EUP
        return a * pl.reciprocal(1.0 + jnp.exp(-a), approx=True)

    # ---- cbs0: 1x1 conv (BN folded) + SiLU; bf16 operands, f32 accumulate ---
    acc0 = jnp.dot(w0_ref[...], x_ref[0], preferred_element_type=f32)
    y = silu(acc0 + b0_ref[...])             # (C_mid, HW) f32

    # ---- chained stride-1 "same" max pools (5, 9, 13), separable H then W ---
    def pool_same(cur, k):
        p = (k - 1) // 2
        # H axis == shifts by multiples of W on the flattened axis; the -inf
        # borders of the scratch provide exact "same" (-inf) padding.
        pad_ref[:, pad_l:pad_l + HW] = cur
        acc = cur
        for d in range(1, p + 1):
            acc = jnp.maximum(acc, pad_ref[:, pad_l + d * W:pad_l + d * W + HW])
            acc = jnp.maximum(acc, pad_ref[:, pad_l - d * W:pad_l - d * W + HW])
        # W axis == shifts by +-d; values leaking across an image-row boundary
        # are masked out with the column index.
        pad_ref[:, pad_l:pad_l + HW] = acc
        out = acc
        for d in range(1, p + 1):
            t = pad_ref[:, pad_l + d:pad_l + d + HW]
            out = jnp.maximum(out, jnp.where(col < W - d, t, _NEG_INF))
            t = pad_ref[:, pad_l - d:pad_l - d + HW]
            out = jnp.maximum(out, jnp.where(col >= d, t, _NEG_INF))
        return out

    p1 = pool_same(y, 5)
    p2 = pool_same(p1, 9)
    p3 = pool_same(p2, 13)

    # ---- cbs5 on the virtual channel-concat: split-weight matmuls -----------
    w5 = w5_ref[...]                         # (C_out, 4*C_mid) bf16
    bf = w5.dtype
    acc5 = jnp.dot(w5[:, 0 * C_mid:1 * C_mid], y.astype(bf),
                   preferred_element_type=f32)
    acc5 = acc5 + jnp.dot(w5[:, 1 * C_mid:2 * C_mid], p1.astype(bf),
                          preferred_element_type=f32)
    acc5 = acc5 + jnp.dot(w5[:, 2 * C_mid:3 * C_mid], p2.astype(bf),
                          preferred_element_type=f32)
    acc5 = acc5 + jnp.dot(w5[:, 3 * C_mid:4 * C_mid], p3.astype(bf),
                          preferred_element_type=f32)
    out = silu(acc5 + b5_ref[...])
    o_ref[0] = out.astype(o_ref.dtype)


# ---------------------------------------------------------------------------
# Wrapper
# ---------------------------------------------------------------------------
def _fold_bn(weight, gamma, beta, mean, var, eps):
    c_out, c_in = weight.shape[0], weight.shape[1]
    w2d = weight.reshape(c_out, c_in).astype(jnp.float32)
    scale = gamma.astype(jnp.float32) / jnp.sqrt(var.astype(jnp.float32) + eps)
    w_eff = w2d * scale[:, None]
    b_eff = beta.astype(jnp.float32) - mean.astype(jnp.float32) * scale
    return w_eff, b_eff


def _vmem_limit_bytes():
    cap = 64 * 1024 * 1024                   # conservative fallback (v7x-safe)
    try:
        cap = int(pltpu.get_tpu_info().vmem_capacity_bytes)
    except Exception:
        pass
    # ~75% of physical (=> 48 MiB on a 64 MiB part), capped at 96 MiB.
    return int(min(cap * 3 // 4, 96 * 1024 * 1024))


def sppf_forward(x, w0, g0, b0, m0, v0, w5, g5, b5, m5, v5, *, eps=1e-3):
    """x: (B, C_in, H, W) f32.  cbs0: C_in -> C_mid; cbs5: 4*C_mid -> C_out."""
    B, C_in, H, W = x.shape
    C_mid = w0.shape[0]
    C_out = w5.shape[0]
    HW = H * W
    pad_l = _round_up(6 * W, 128)            # lane-aligned pad, >= largest halo

    w0_eff, b0_eff = _fold_bn(w0, g0, b0, m0, v0, eps)
    w5_eff, b5_eff = _fold_bn(w5, g5, b5, m5, v5, eps)

    x_flat = x.reshape(B, C_in, HW).astype(jnp.bfloat16)        # bf16 MXU input
    col = jnp.tile(jnp.arange(W, dtype=jnp.int32), H)[None, :]  # (1, HW)

    kernel = functools.partial(_sppf_fused_kernel, H=H, W=W, pad_l=pad_l)

    cost = pl.CostEstimate(
        flops=2 * B * HW * C_mid * (C_in + 4 * C_out) + 2 * B * C_mid * HW * 48,
        transcendentals=B * HW * (C_mid + C_out),
        bytes_accessed=(2 * B * C_in * HW + 4 * B * C_out * HW
                        + 2 * C_mid * (C_in + 4 * C_out)
                        + 4 * (C_mid + C_out) + 4 * HW),
    )

    out = pl.pallas_call(
        kernel,
        out_shape=jax.ShapeDtypeStruct((B, C_out, HW), x.dtype),
        grid_spec=pltpu.PrefetchScalarGridSpec(
            num_scalar_prefetch=0,
            grid=(B,),
            in_specs=[
                pl.BlockSpec((1, HW), lambda b: (0, 0)),              # col ids
                pl.BlockSpec((1, C_in, HW), lambda b: (b, 0, 0)),     # x
                pl.BlockSpec((C_mid, C_in), lambda b: (0, 0)),        # w0_eff
                pl.BlockSpec((C_mid, 1), lambda b: (0, 0)),           # b0_eff
                pl.BlockSpec((C_out, 4 * C_mid), lambda b: (0, 0)),   # w5_eff
                pl.BlockSpec((C_out, 1), lambda b: (0, 0)),           # b5_eff
            ],
            out_specs=pl.BlockSpec((1, C_out, HW), lambda b: (b, 0, 0)),
            scratch_shapes=[pltpu.VMEM((C_mid, pad_l + HW + pad_l), jnp.float32)],
        ),
        compiler_params=pltpu.CompilerParams(
            dimension_semantics=("parallel",),
            vmem_limit_bytes=_vmem_limit_bytes()),
        cost_estimate=cost,
    )(col, x_flat,
      w0_eff.astype(jnp.bfloat16), b0_eff[:, None],
      w5_eff.astype(jnp.bfloat16), b5_eff[:, None])

    return out.reshape(B, C_out, H, W)


# ---------------------------------------------------------------------------
# Pure-JAX references
# ---------------------------------------------------------------------------
def _bf16_round(a):
    return a.astype(jnp.bfloat16).astype(jnp.float32)


def _ref_maxpool(x, k):
    p = (k - 1) // 2
    return lax.reduce_window(x, -jnp.inf, lax.max,
                             window_dimensions=(1, 1, k, k),
                             window_strides=(1, 1, 1, 1),
                             padding=((0, 0), (0, 0), (p, p), (p, p)))


def _ref_cbs_f32(x, w, gamma, beta, mean, var, eps):
    c_out, c_in = w.shape[0], w.shape[1]
    y = jnp.einsum("oc,bchw->bohw", w.reshape(c_out, c_in), x,
                   precision=lax.Precision.HIGHEST)
    s = (gamma / jnp.sqrt(var + eps))[None, :, None, None]
    y = (y - mean[None, :, None, None]) * s + beta[None, :, None, None]
    return y * jax.nn.sigmoid(y)


def _ref_sppf_f32(x, w0, g0, b0, m0, v0, w5, g5, b5, m5, v5, eps=1e-3):
    y = _ref_cbs_f32(x, w0, g0, b0, m0, v0, eps)
    x0 = _ref_maxpool(y, 5)
    x1 = _ref_maxpool(x0, 9)
    x2 = _ref_maxpool(x1, 13)
    cat = jnp.concatenate([y, x0, x1, x2], axis=1)
    return _ref_cbs_f32(cat, w5, g5, b5, m5, v5, eps)


def _sim_cbs_bf16(x, w_eff, b_eff):
    # Mirrors the kernel: BN folded, bf16 matmul operands, f32 accumulation.
    y = jnp.einsum("oc,bchw->bohw", _bf16_round(w_eff), _bf16_round(x),
                   precision=lax.Precision.HIGHEST)
    y = y + b_eff[None, :, None, None]
    return y * jax.nn.sigmoid(y)


def _ref_sppf_bf16sim(x, w0, g0, b0, m0, v0, w5, g5, b5, m5, v5, eps=1e-3):
    w0_eff, b0_eff = _fold_bn(w0, g0, b0, m0, v0, eps)
    w5_eff, b5_eff = _fold_bn(w5, g5, b5, m5, v5, eps)
    y = _sim_cbs_bf16(x, w0_eff, b0_eff)
    x0 = _ref_maxpool(y, 5)
    x1 = _ref_maxpool(x0, 9)
    x2 = _ref_maxpool(x1, 13)
    cat = jnp.concatenate([y, x0, x1, x2], axis=1)
    return _sim_cbs_bf16(cat, w5_eff, b5_eff)


# ---------------------------------------------------------------------------
# Test
# ---------------------------------------------------------------------------
if __name__ == "__main__":
    # sppf(in_=4, out_=8) on a 16x16 map: cbs0 4->2, cbs5 8->8.
    B, in_, H, W = 2, 4, 16, 16
    out_ = 8
    c_mid = in_ // 2
    eps = 1e-3

    key = jax.random.PRNGKey(0)
    ks = jax.random.split(key, 11)
    x = jax.random.normal(ks[0], (B, in_, H, W), dtype=jnp.float32)

    # cbs0 params (Conv2d(in_, in_//2, 1, bias=False) + BN running stats).
    w0 = jax.random.normal(ks[1], (c_mid, in_, 1, 1), jnp.float32) * 0.3
    g0 = 1.0 + 0.1 * jax.random.normal(ks[2], (c_mid,), jnp.float32)
    b0 = 0.1 * jax.random.normal(ks[3], (c_mid,), jnp.float32)
    m0 = 0.1 * jax.random.normal(ks[4], (c_mid,), jnp.float32)
    v0 = jax.random.uniform(ks[5], (c_mid,), jnp.float32, 0.5, 1.5)

    # cbs5 params (Conv2d(2*in_, out_, 1, bias=False) + BN running stats).
    w5 = jax.random.normal(ks[6], (out_, 4 * c_mid, 1, 1), jnp.float32) * 0.3
    g5 = 1.0 + 0.1 * jax.random.normal(ks[7], (out_,), jnp.float32)
    b5 = 0.1 * jax.random.normal(ks[8], (out_,), jnp.float32)
    m5 = 0.1 * jax.random.normal(ks[9], (out_,), jnp.float32)
    v5 = jax.random.uniform(ks[10], (out_,), jnp.float32, 0.5, 1.5)

    out = sppf_forward(x, w0, g0, b0, m0, v0, w5, g5, b5, m5, v5, eps=eps)
    out = jax.block_until_ready(out)
    assert out.shape == (B, out_, H, W)

    # Structural check vs. a reference that mirrors the kernel's bf16 MXU
    # operands (remaining delta: approx-reciprocal SiLU + accumulation order).
    ref_sim = _ref_sppf_bf16sim(x, w0, g0, b0, m0, v0, w5, g5, b5, m5, v5, eps=eps)
    err_sim = float(jnp.max(jnp.abs(out - ref_sim)))
    assert jnp.allclose(out, ref_sim, atol=3e-2, rtol=3e-2), err_sim

    # Sanity check vs. the pure-f32 PyTorch-equivalent reference (bf16 operand
    # rounding accounts for the looser tolerance).
    ref = _ref_sppf_f32(x, w0, g0, b0, m0, v0, w5, g5, b5, m5, v5, eps=eps)
    err = float(jnp.max(jnp.abs(out - ref)))
    assert jnp.allclose(out, ref, atol=1.5e-1, rtol=1.5e-1), err

    print("KERNEL_OK")
</pallas_src>

<mosaic_0001>
module attributes {stable_mosaic.version = 11 : i64} {
  func.func @_sppf_fused_kernel(%arg0: i32, %arg1: memref<1x256xi32, #tpu.memory_space<vmem>>, %arg2: memref<1x4x256xbf16, #tpu.memory_space<vmem>>, %arg3: memref<2x4xbf16, #tpu.memory_space<vmem>>, %arg4: memref<2x1xf32, #tpu.memory_space<vmem>>, %arg5: memref<8x8xbf16, #tpu.memory_space<vmem>>, %arg6: memref<8x1xf32, #tpu.memory_space<vmem>>, %arg7: memref<1x8x256xf32, #tpu.memory_space<vmem>>, %arg8: memref<2x512xf32, #tpu.memory_space<vmem>>) attributes {dimension_semantics = [#tpu.dimension_semantics<parallel>], iteration_bounds = array<i64: 2>, scalar_prefetch = 0 : i64, scratch_operands = 1 : i64, tpu.core_type = #tpu.core_type<tc>, window_params = [{pipeline_mode = #tpu.pipeline_mode<synchronous>, transform_indices = @transform_0, window_bounds = array<i64: 1, 256>}, {transform_indices = @transform_1, window_bounds = array<i64: 1, 4, 256>}, {pipeline_mode = #tpu.pipeline_mode<synchronous>, transform_indices = @transform_2, window_bounds = array<i64: 2, 4>}, {pipeline_mode = #tpu.pipeline_mode<synchronous>, transform_indices = @transform_3, window_bounds = array<i64: 2, 1>}, {pipeline_mode = #tpu.pipeline_mode<synchronous>, transform_indices = @transform_4, window_bounds = array<i64: 8, 8>}, {pipeline_mode = #tpu.pipeline_mode<synchronous>, transform_indices = @transform_5, window_bounds = array<i64: 8, 1>}, {transform_indices = @transform_6, window_bounds = array<i64: 1, 8, 256>}]} {
    %cst = arith.constant 0xFF800000 : f32
    %0 = vector.broadcast %cst : f32 to vector<2x128xf32>
    %c0 = arith.constant 0 : index
    %c0_0 = arith.constant 0 : index
    %1 = vector.load %arg8[%c0, %c0_0] : memref<2x512xf32, #tpu.memory_space<vmem>>, vector<2x128xf32>
    tpu.vector_store %arg8[%c0, %c0_0], %0 {strides = array<i32>} : memref<2x512xf32, #tpu.memory_space<vmem>>, vector<2x128xf32>,
    %cst_1 = arith.constant 0xFF800000 : f32
    %2 = vector.broadcast %cst_1 : f32 to vector<2x128xf32>
    %c0_2 = arith.constant 0 : index
    %c384 = arith.constant 384 : index
    %3 = vector.load %arg8[%c0_2, %c384] : memref<2x512xf32, #tpu.memory_space<vmem>>, vector<2x128xf32>
    tpu.vector_store %arg8[%c0_2, %c384], %2 {strides = array<i32>} : memref<2x512xf32, #tpu.memory_space<vmem>>, vector<2x128xf32>,
    %c0_3 = arith.constant 0 : index
    %c0_4 = arith.constant 0 : index
    %4 = vector.load %arg1[%c0_3, %c0_4] : memref<1x256xi32, #tpu.memory_space<vmem>>, vector<1x256xi32>
    %c0_5 = arith.constant 0 : index
    %c0_6 = arith.constant 0 : index
    %5 = vector.load %arg3[%c0_5, %c0_6] : memref<2x4xbf16, #tpu.memory_space<vmem>>, vector<2x4xbf16>
    %c0_7 = arith.constant 0 : index
    %c0_8 = arith.constant 0 : index
    %c0_9 = arith.constant 0 : index
    %6 = vector.load %arg2[%c0_7, %c0_8, %c0_9] : memref<1x4x256xbf16, #tpu.memory_space<vmem>>, vector<1x4x256xbf16>
    %7 = vector.shape_cast %6 : vector<1x4x256xbf16> to vector<4x256xbf16>
    %cst_10 = arith.constant dense<0.000000e+00> : vector<2x256xf32>
    %8 = tpu.matmul %5, %7, %cst_10 {dimension_numbers = #tpu.dot_dimension_numbers<[1], [0], [0], [1], [0, 0, 1, 1], [], []>} : vector<2x4xbf16>, vector<4x256xbf16>, vector<2x256xf32> -> vector<2x256xf32>
    %c0_11 = arith.constant 0 : index
    %c0_12 = arith.constant 0 : index
    %9 = vector.load %arg4[%c0_11, %c0_12] : memref<2x1xf32, #tpu.memory_space<vmem>>, vector<2x1xf32>
    %10 = vector.broadcast %9 : vector<2x1xf32> to vector<2x256xf32>
    %11 = arith.addf %8, %10 : vector<2x256xf32>
    %cst_13 = arith.constant 0.000000e+00 : f32
    %12 = vector.broadcast %cst_13 : f32 to vector<2x256xf32>
    %13 = arith.subf %12, %11 : vector<2x256xf32>
    %14 = math.exp %13 : vector<2x256xf32>
    %cst_14 = arith.constant 1.000000e+00 : f32
    %15 = vector.broadcast %cst_14 : f32 to vector<2x256xf32>
    %16 = arith.addf %15, %14 : vector<2x256xf32>
    %17 = tpu.reciprocal %16 {approx = true} : vector<2x256xf32> -> vector<2x256xf32>
    %18 = arith.mulf %11, %17 : vector<2x256xf32>
    %c0_15 = arith.constant 0 : index
    %c128 = arith.constant 128 : index
    %19 = vector.load %arg8[%c0_15, %c128] : memref<2x512xf32, #tpu.memory_space<vmem>>, vector<2x256xf32>
    tpu.vector_store %arg8[%c0_15, %c128], %18 {strides = array<i32>} : memref<2x512xf32, #tpu.memory_space<vmem>>, vector<2x256xf32>,
    %c0_16 = arith.constant 0 : index
    %c144 = arith.constant 144 : index
    %20 = vector.load %arg8[%c0_16, %c144] : memref<2x512xf32, #tpu.memory_space<vmem>>, vector<2x256xf32>
    %21 = arith.maximumf %18, %20 : vector<2x256xf32>
    %c0_17 = arith.constant 0 : index
    %c112 = arith.constant 112 : index
    %22 = vector.load %arg8[%c0_17, %c112] : memref<2x512xf32, #tpu.memory_space<vmem>>, vector<2x256xf32>
    %23 = arith.maximumf %21, %22 : vector<2x256xf32>
    %c0_18 = arith.constant 0 : index
    %c160 = arith.constant 160 : index
    %24 = vector.load %arg8[%c0_18, %c160] : memref<2x512xf32, #tpu.memory_space<vmem>>, vector<2x256xf32>
    %25 = arith.maximumf %23, %24 : vector<2x256xf32>
    %c0_19 = arith.constant 0 : index
    %c96 = arith.constant 96 : index
    %26 = vector.load %arg8[%c0_19, %c96] : memref<2x512xf32, #tpu.memory_space<vmem>>, vector<2x256xf32>
    %27 = arith.maximumf %25, %26 : vector<2x256xf32>
    %c0_20 = arith.constant 0 : index
    %c128_21 = arith.constant 128 : index
    %28 = vector.load %arg8[%c0_20, %c128_21] : memref<2x512xf32, #tpu.memory_space<vmem>>, vector<2x256xf32>
    tpu.vector_store %arg8[%c0_20, %c128_21], %27 {strides = array<i32>} : memref<2x512xf32, #tpu.memory_space<vmem>>, vector<2x256xf32>,
    %c0_22 = arith.constant 0 : index
    %c129 = arith.constant 129 : index
    %29 = vector.load %arg8[%c0_22, %c129] : memref<2x512xf32, #tpu.memory_space<vmem>>, vector<2x256xf32>
    %c15_i32 = arith.constant 15 : i32
    %30 = vector.broadcast %c15_i32 : i32 to vector<1x256xi32>
    %31 = arith.cmpi slt, %4, %30 : vector<1x256xi32>
    %cst_23 = arith.constant 0xFF800000 : f32
    %32 = vector.shape_cast %31 : vector<1x256xi1> to vector<1x256xi1>
    %33 = vector.broadcast %32 : vector<1x256xi1> to vector<2x256xi1>
    %34 = vector.broadcast %cst_23 : f32 to vector<2x256xf32>
    %35 = arith.select %33, %29, %34 : vector<2x256xi1>, vector<2x256xf32>
    %36 = arith.maximumf %27, %35 : vector<2x256xf32>
    %c0_24 = arith.constant 0 : index
    %c127 = arith.constant 127 : index
    %37 = vector.load %arg8[%c0_24, %c127] : memref<2x512xf32, #tpu.memory_space<vmem>>, vector<2x256xf32>
    %c1_i32 = arith.constant 1 : i32
    %38 = vector.broadcast %c1_i32 : i32 to vector<1x256xi32>
    %39 = arith.cmpi sge, %4, %38 : vector<1x256xi32>
    %cst_25 = arith.constant 0xFF800000 : f32
    %40 = vector.shape_cast %39 : vector<1x256xi1> to vector<1x256xi1>
    %41 = vector.broadcast %40 : vector<1x256xi1> to vector<2x256xi1>
    %42 = vector.broadcast %cst_25 : f32 to vector<2x256xf32>
    %43 = arith.select %41, %37, %42 : vector<2x256xi1>, vector<2x256xf32>
    %44 = arith.maximumf %36, %43 : vector<2x256xf32>
    %c0_26 = arith.constant 0 : index
    %c130 = arith.constant 130 : index
    %45 = vector.load %arg8[%c0_26, %c130] : memref<2x512xf32, #tpu.memory_space<vmem>>, vector<2x256xf32>
    %c14_i32 = arith.constant 14 : i32
    %46 = vector.broadcast %c14_i32 : i32 to vector<1x256xi32>
    %47 = arith.cmpi slt, %4, %46 : vector<1x256xi32>
    %cst_27 = arith.constant 0xFF800000 : f32
    %48 = vector.shape_cast %47 : vector<1x256xi1> to vector<1x256xi1>
    %49 = vector.broadcast %48 : vector<1x256xi1> to vector<2x256xi1>
    %50 = vector.broadcast %cst_27 : f32 to vector<2x256xf32>
    %51 = arith.select %49, %45, %50 : vector<2x256xi1>, vector<2x256xf32>
    %52 = arith.maximumf %44, %51 : vector<2x256xf32>
    %c0_28 = arith.constant 0 : index
    %c126 = arith.constant 126 : index
    %53 = vector.load %arg8[%c0_28, %c126] : memref<2x512xf32, #tpu.memory_space<vmem>>, vector<2x256xf32>
    %c2_i32 = arith.constant 2 : i32
    %54 = vector.broadcast %c2_i32 : i32 to vector<1x256xi32>
    %55 = arith.cmpi sge, %4, %54 : vector<1x256xi32>
    %cst_29 = arith.constant 0xFF800000 : f32
    %56 = vector.shape_cast %55 : vector<1x256xi1> to vector<1x256xi1>
    %57 = vector.broadcast %56 : vector<1x256xi1> to vector<2x256xi1>
    %58 = vector.broadcast %cst_29 : f32 to vector<2x256xf32>
    %59 = arith.select %57, %53, %58 : vector<2x256xi1>, vector<2x256xf32>
    %60 = arith.maximumf %52, %59 : vector<2x256xf32>
    %c0_30 = arith.constant 0 : index
    %c128_31 = arith.constant 128 : index
    %61 = vector.load %arg8[%c0_30, %c128_31] : memref<2x512xf32, #tpu.memory_space<vmem>>, vector<2x256xf32>
    tpu.vector_store %arg8[%c0_30, %c128_31], %60 {strides = array<i32>} : memref<2x512xf32, #tpu.memory_space<vmem>>, vector<2x256xf32>,
    %c0_32 = arith.constant 0 : index
    %c144_33 = arith.constant 144 : index
    %62 = vector.load %arg8[%c0_32, %c144_33] : memref<2x512xf32, #tpu.memory_space<vmem>>, vector<2x256xf32>
    %63 = arith.maximumf %60, %62 : vector<2x256xf32>
    %c0_34 = arith.constant 0 : index
    %c112_35 = arith.constant 112 : index
    %64 = vector.load %arg8[%c0_34, %c112_35] : memref<2x512xf32, #tpu.memory_space<vmem>>, vector<2x256xf32>
    %65 = arith.maximumf %63, %64 : vector<2x256xf32>
    %c0_36 = arith.constant 0 : index
    %c160_37 = arith.constant 160 : index
    %66 = vector.load %arg8[%c0_36, %c160_37] : memref<2x512xf32, #tpu.memory_space<vmem>>, vector<2x256xf32>
    %67 = arith.maximumf %65, %66 : vector<2x256xf32>
    %c0_38 = arith.constant 0 : index
    %c96_39 = arith.constant 96 : index
    %68 = vector.load %arg8[%c0_38, %c96_39] : memref<2x512xf32, #tpu.memory_space<vmem>>, vector<2x256xf32>
    %69 = arith.maximumf %67, %68 : vector<2x256xf32>
    %c0_40 = arith.constant 0 : index
    %c176 = arith.constant 176 : index
    %70 = vector.load %arg8[%c0_40, %c176] : memref<2x512xf32, #tpu.memory_space<vmem>>, vector<2x256xf32>
    %71 = arith.maximumf %69, %70 : vector<2x256xf32>
    %c0_41 = arith.constant 0 : index
    %c80 = arith.constant 80 : index
    %72 = vector.load %arg8[%c0_41, %c80] : memref<2x512xf32, #tpu.memory_space<vmem>>, vector<2x256xf32>
    %73 = arith.maximumf %71, %72 : vector<2x256xf32>
    %c0_42 = arith.constant 0 : index
    %c192 = arith.constant 192 : index
    %74 = vector.load %arg8[%c0_42, %c192] : memref<2x512xf32, #tpu.memory_space<vmem>>, vector<2x256xf32>
    %75 = arith.maximumf %73, %74 : vector<2x256xf32>
    %c0_43 = arith.constant 0 : index
    %c64 = arith.constant 64 : index
    %76 = vector.load %arg8[%c0_43, %c64] : memref<2x512xf32, #tpu.memory_space<vmem>>, vector<2x256xf32>
    %77 = arith.maximumf %75, %76 : vector<2x256xf32>
    %c0_44 = arith.constant 0 : index
    %c128_45 = arith.constant 128 : index
    %78 = vector.load %arg8[%c0_44, %c128_45] : memref<2x512xf32, #tpu.memory_space<vmem>>, vector<2x256xf32>
    tpu.vector_store %arg8[%c0_44, %c128_45], %77 {strides = array<i32>} : memref<2x512xf32, #tpu.memory_space<vmem>>, vector<2x256xf32>,
    %c0_46 = arith.constant 0 : index
    %c129_47 = arith.constant 129 : index
    %79 = vector.load %arg8[%c0_46, %c129_47] : memref<2x512xf32, #tpu.memory_space<vmem>>, vector<2x256xf32>
    %c15_i32_48 = arith.constant 15 : i32
    %80 = vector.broadcast %c15_i32_48 : i32 to vector<1x256xi32>
    %81 = arith.cmpi slt, %4, %80 : vector<1x256xi32>
    %cst_49 = arith.constant 0xFF800000 : f32
    %82 = vector.shape_cast %81 : vector<1x256xi1> to vector<1x256xi1>
    %83 = vector.broadcast %82 : vector<1x256xi1> to vector<2x256xi1>
    %84 = vector.broadcast %cst_49 : f32 to vector<2x256xf32>
    %85 = arith.select %83, %79, %84 : vector<2x256xi1>, vector<2x256xf32>
    %86 = arith.maximumf %77, %85 : vector<2x256xf32>
    %c0_50 = arith.constant 0 : index
    %c127_51 = arith.constant 127 : index
    %87 = vector.load %arg8[%c0_50, %c127_51] : memref<2x512xf32, #tpu.memory_space<vmem>>, vector<2x256xf32>
    %c1_i32_52 = arith.constant 1 : i32
    %88 = vector.broadcast %c1_i32_52 : i32 to vector<1x256xi32>
    %89 = arith.cmpi sge, %4, %88 : vector<1x256xi32>
    %cst_53 = arith.constant 0xFF800000 : f32
    %90 = vector.shape_cast %89 : vector<1x256xi1> to vector<1x256xi1>
    %91 = vector.broadcast %90 : vector<1x256xi1> to vector<2x256xi1>
    %92 = vector.broadcast %cst_53 : f32 to vector<2x256xf32>
    %93 = arith.select %91, %87, %92 : vector<2x256xi1>, vector<2x256xf32>
    %94 = arith.maximumf %86, %93 : vector<2x256xf32>
    %c0_54 = arith.constant 0 : index
    %c130_55 = arith.constant 130 : index
    %95 = vector.load %arg8[%c0_54, %c130_55] : memref<2x512xf32, #tpu.memory_space<vmem>>, vector<2x256xf32>
    %c14_i32_56 = arith.constant 14 : i32
    %96 = vector.broadcast %c14_i32_56 : i32 to vector<1x256xi32>
    %97 = arith.cmpi slt, %4, %96 : vector<1x256xi32>
    %cst_57 = arith.constant 0xFF800000 : f32
    %98 = vector.shape_cast %97 : vector<1x256xi1> to vector<1x256xi1>
    %99 = vector.broadcast %98 : vector<1x256xi1> to vector<2x256xi1>
    %100 = vector.broadcast %cst_57 : f32 to vector<2x256xf32>
    %101 = arith.select %99, %95, %100 : vector<2x256xi1>, vector<2x256xf32>
    %102 = arith.maximumf %94, %101 : vector<2x256xf32>
    %c0_58 = arith.constant 0 : index
    %c126_59 = arith.constant 126 : index
    %103 = vector.load %arg8[%c0_58, %c126_59] : memref<2x512xf32, #tpu.memory_space<vmem>>, vector<2x256xf32>
    %c2_i32_60 = arith.constant 2 : i32
    %104 = vector.broadcast %c2_i32_60 : i32 to vector<1x256xi32>
    %105 = arith.cmpi sge, %4, %104 : vector<1x256xi32>
    %cst_61 = arith.constant 0xFF800000 : f32
    %106 = vector.shape_cast %105 : vector<1x256xi1> to vector<1x256xi1>
    %107 = vector.broadcast %106 : vector<1x256xi1> to vector<2x256xi1>
    %108 = vector.broadcast %cst_61 : f32 to vector<2x256xf32>
    %109 = arith.select %107, %103, %108 : vector<2x256xi1>, vector<2x256xf32>
    %110 = arith.maximumf %102, %109 : vector<2x256xf32>
    %c0_62 = arith.constant 0 : index
    %c131 = arith.constant 131 : index
    %111 = vector.load %arg8[%c0_62, %c131] : memref<2x512xf32, #tpu.memory_space<vmem>>, vector<2x256xf32>
    %c13_i32 = arith.constant 13 : i32
    %112 = vector.broadcast %c13_i32 : i32 to vector<1x256xi32>
    %113 = arith.cmpi slt, %4, %112 : vector<1x256xi32>
    %cst_63 = arith.constant 0xFF800000 : f32
    %114 = vector.shape_cast %113 : vector<1x256xi1> to vector<1x256xi1>
    %115 = vector.broadcast %114 : vector<1x256xi1> to vector<2x256xi1>
    %116 = vector.broadcast %cst_63 : f32 to vector<2x256xf32>
    %117 = arith.select %115, %111, %116 : vector<2x256xi1>, vector<2x256xf32>
    %118 = arith.maximumf %110, %117 : vector<2x256xf32>
    %c0_64 = arith.constant 0 : index
    %c125 = arith.constant 125 : index
    %119 = vector.load %arg8[%c0_64, %c125] : memref<2x512xf32, #tpu.memory_space<vmem>>, vector<2x256xf32>
    %c3_i32 = arith.constant 3 : i32
    %120 = vector.broadcast %c3_i32 : i32 to vector<1x256xi32>
    %121 = arith.cmpi sge, %4, %120 : vector<1x256xi32>
    %cst_65 = arith.constant 0xFF800000 : f32
    %122 = vector.shape_cast %121 : vector<1x256xi1> to vector<1x256xi1>
    %123 = vector.broadcast %122 : vector<1x256xi1> to vector<2x256xi1>
    %124 = vector.broadcast %cst_65 : f32 to vector<2x256xf32>
    %125 = arith.select %123, %119, %124 : vector<2x256xi1>, vector<2x256xf32>
    %126 = arith.maximumf %118, %125 : vector<2x256xf32>
    %c0_66 = arith.constant 0 : index
    %c132 = arith.constant 132 : index
    %127 = vector.load %arg8[%c0_66, %c132] : memref<2x512xf32, #tpu.memory_space<vmem>>, vector<2x256xf32>
    %c12_i32 = arith.constant 12 : i32
    %128 = vector.broadcast %c12_i32 : i32 to vector<1x256xi32>
    %129 = arith.cmpi slt, %4, %128 : vector<1x256xi32>
    %cst_67 = arith.constant 0xFF800000 : f32
    %130 = vector.shape_cast %129 : vector<1x256xi1> to vector<1x256xi1>
    %131 = vector.broadcast %130 : vector<1x256xi1> to vector<2x256xi1>
    %132 = vector.broadcast %cst_67 : f32 to vector<2x256xf32>
    %133 = arith.select %131, %127, %132 : vector<2x256xi1>, vector<2x256xf32>
    %134 = arith.maximumf %126, %133 : vector<2x256xf32>
    %c0_68 = arith.constant 0 : index
    %c124 = arith.constant 124 : index
    %135 = vector.load %arg8[%c0_68, %c124] : memref<2x512xf32, #tpu.memory_space<vmem>>, vector<2x256xf32>
    %c4_i32 = arith.constant 4 : i32
    %136 = vector.broadcast %c4_i32 : i32 to vector<1x256xi32>
    %137 = arith.cmpi sge, %4, %136 : vector<1x256xi32>
    %cst_69 = arith.constant 0xFF800000 : f32
    %138 = vector.shape_cast %137 : vector<1x256xi1> to vector<1x256xi1>
    %139 = vector.broadcast %138 : vector<1x256xi1> to vector<2x256xi1>
    %140 = vector.broadcast %cst_69 : f32 to vector<2x256xf32>
    %141 = arith.select %139, %135, %140 : vector<2x256xi1>, vector<2x256xf32>
    %142 = arith.maximumf %134, %141 : vector<2x256xf32>
    %c0_70 = arith.constant 0 : index
    %c128_71 = arith.constant 128 : index
    %143 = vector.load %arg8[%c0_70, %c128_71] : memref<2x512xf32, #tpu.memory_space<vmem>>, vector<2x256xf32>
    tpu.vector_store %arg8[%c0_70, %c128_71], %142 {strides = array<i32>} : memref<2x512xf32, #tpu.memory_space<vmem>>, vector<2x256xf32>,
    %c0_72 = arith.constant 0 : index
    %c144_73 = arith.constant 144 : index
    %144 = vector.load %arg8[%c0_72, %c144_73] : memref<2x512xf32, #tpu.memory_space<vmem>>, vector<2x256xf32>
    %145 = arith.maximumf %142, %144 : vector<2x256xf32>
    %c0_74 = arith.constant 0 : index
    %c112_75 = arith.constant 112 : index
    %146 = vector.load %arg8[%c0_74, %c112_75] : memref<2x512xf32, #tpu.memory_space<vmem>>, vector<2x256xf32>
    %147 = arith.maximumf %145, %146 : vector<2x256xf32>
    %c0_76 = arith.constant 0 : index
    %c160_77 = arith.constant 160 : index
    %148 = vector.load %arg8[%c0_76, %c160_77] : memref<2x512xf32, #tpu.memory_space<vmem>>, vector<2x256xf32>
    %149 = arith.maximumf %147, %148 : vector<2x256xf32>
    %c0_78 = arith.constant 0 : index
    %c96_79 = arith.constant 96 : index
    %150 = vector.load %arg8[%c0_78, %c96_79] : memref<2x512xf32, #tpu.memory_space<vmem>>, vector<2x256xf32>
    %151 = arith.maximumf %149, %150 : vector<2x256xf32>
    %c0_80 = arith.constant 0 : index
    %c176_81 = arith.constant 176 : index
    %152 = vector.load %arg8[%c0_80, %c176_81] : memref<2x512xf32, #tpu.memory_space<vmem>>, vector<2x256xf32>
    %153 = arith.maximumf %151, %152 : vector<2x256xf32>
    %c0_82 = arith.constant 0 : index
    %c80_83 = arith.constant 80 : index
    %154 = vector.load %arg8[%c0_82, %c80_83] : memref<2x512xf32, #tpu.memory_space<vmem>>, vector<2x256xf32>
    %155 = arith.maximumf %153, %154 : vector<2x256xf32>
    %c0_84 = arith.constant 0 : index
    %c192_85 = arith.constant 192 : index
    %156 = vector.load %arg8[%c0_84, %c192_85] : memref<2x512xf32, #tpu.memory_space<vmem>>, vector<2x256xf32>
    %157 = arith.maximumf %155, %156 : vector<2x256xf32>
    %c0_86 = arith.constant 0 : index
    %c64_87 = arith.constant 64 : index
    %158 = vector.load %arg8[%c0_86, %c64_87] : memref<2x512xf32, #tpu.memory_space<vmem>>, vector<2x256xf32>
    %159 = arith.maximumf %157, %158 : vector<2x256xf32>
    %c0_88 = arith.constant 0 : index
    %c208 = arith.constant 208 : index
    %160 = vector.load %arg8[%c0_88, %c208] : memref<2x512xf32, #tpu.memory_space<vmem>>, vector<2x256xf32>
    %161 = arith.maximumf %159, %160 : vector<2x256xf32>
    %c0_89 = arith.constant 0 : index
    %c48 = arith.constant 48 : index
    %162 = vector.load %arg8[%c0_89, %c48] : memref<2x512xf32, #tpu.memory_space<vmem>>, vector<2x256xf32>
    %163 = arith.maximumf %161, %162 : vector<2x256xf32>
    %c0_90 = arith.constant 0 : index
    %c224 = arith.constant 224 : index
    %164 = vector.load %arg8[%c0_90, %c224] : memref<2x512xf32, #tpu.memory_space<vmem>>, vector<2x256xf32>
    %165 = arith.maximumf %163, %164 : vector<2x256xf32>
    %c0_91 = arith.constant 0 : index
    %c32 = arith.constant 32 : index
    %166 = vector.load %arg8[%c0_91, %c32] : memref<2x512xf32, #tpu.memory_space<vmem>>, vector<2x256xf32>
    %167 = arith.maximumf %165, %166 : vector<2x256xf32>
    %c0_92 = arith.constant 0 : index
    %c128_93 = arith.constant 128 : index
    %168 = vector.load %arg8[%c0_92, %c128_93] : memref<2x512xf32, #tpu.memory_space<vmem>>, vector<2x256xf32>
    tpu.vector_store %arg8[%c0_92, %c128_93], %167 {strides = array<i32>} : memref<2x512xf32, #tpu.memory_space<vmem>>, vector<2x256xf32>,
    %c0_94 = arith.constant 0 : index
    %c129_95 = arith.constant 129 : index
    %169 = vector.load %arg8[%c0_94, %c129_95] : memref<2x512xf32, #tpu.memory_space<vmem>>, vector<2x256xf32>
    %c15_i32_96 = arith.constant 15 : i32
    %170 = vector.broadcast %c15_i32_96 : i32 to vector<1x256xi32>
    %171 = arith.cmpi slt, %4, %170 : vector<1x256xi32>
    %cst_97 = arith.constant 0xFF800000 : f32
    %172 = vector.shape_cast %171 : vector<1x256xi1> to vector<1x256xi1>
    %173 = vector.broadcast %172 : vector<1x256xi1> to vector<2x256xi1>
    %174 = vector.broadcast %cst_97 : f32 to vector<2x256xf32>
    %175 = arith.select %173, %169, %174 : vector<2x256xi1>, vector<2x256xf32>
    %176 = arith.maximumf %167, %175 : vector<2x256xf32>
    %c0_98 = arith.constant 0 : index
    %c127_99 = arith.constant 127 : index
    %177 = vector.load %arg8[%c0_98, %c127_99] : memref<2x512xf32, #tpu.memory_space<vmem>>, vector<2x256xf32>
    %c1_i32_100 = arith.constant 1 : i32
    %178 = vector.broadcast %c1_i32_100 : i32 to vector<1x256xi32>
    %179 = arith.cmpi sge, %4, %178 : vector<1x256xi32>
    %cst_101 = arith.constant 0xFF800000 : f32
    %180 = vector.shape_cast %179 : vector<1x256xi1> to vector<1x256xi1>
    %181 = vector.broadcast %180 : vector<1x256xi1> to vector<2x256xi1>
    %182 = vector.broadcast %cst_101 : f32 to vector<2x256xf32>
    %183 = arith.select %181, %177, %182 : vector<2x256xi1>, vector<2x256xf32>
    %184 = arith.maximumf %176, %183 : vector<2x256xf32>
    %c0_102 = arith.constant 0 : index
    %c130_103 = arith.constant 130 : index
    %185 = vector.load %arg8[%c0_102, %c130_103] : memref<2x512xf32, #tpu.memory_space<vmem>>, vector<2x256xf32>
    %c14_i32_104 = arith.constant 14 : i32
    %186 = vector.broadcast %c14_i32_104 : i32 to vector<1x256xi32>
    %187 = arith.cmpi slt, %4, %186 : vector<1x256xi32>
    %cst_105 = arith.constant 0xFF800000 : f32
    %188 = vector.shape_cast %187 : vector<1x256xi1> to vector<1x256xi1>
    %189 = vector.broadcast %188 : vector<1x256xi1> to vector<2x256xi1>
    %190 = vector.broadcast %cst_105 : f32 to vector<2x256xf32>
    %191 = arith.select %189, %185, %190 : vector<2x256xi1>, vector<2x256xf32>
    %192 = arith.maximumf %184, %191 : vector<2x256xf32>
    %c0_106 = arith.constant 0 : index
    %c126_107 = arith.constant 126 : index
    %193 = vector.load %arg8[%c0_106, %c126_107] : memref<2x512xf32, #tpu.memory_space<vmem>>, vector<2x256xf32>
    %c2_i32_108 = arith.constant 2 : i32
    %194 = vector.broadcast %c2_i32_108 : i32 to vector<1x256xi32>
    %195 = arith.cmpi sge, %4, %194 : vector<1x256xi32>
    %cst_109 = arith.constant 0xFF800000 : f32
    %196 = vector.shape_cast %195 : vector<1x256xi1> to vector<1x256xi1>
    %197 = vector.broadcast %196 : vector<1x256xi1> to vector<2x256xi1>
    %198 = vector.broadcast %cst_109 : f32 to vector<2x256xf32>
    %199 = arith.select %197, %193, %198 : vector<2x256xi1>, vector<2x256xf32>
    %200 = arith.maximumf %192, %199 : vector<2x256xf32>
    %c0_110 = arith.constant 0 : index
    %c131_111 = arith.constant 131 : index
    %201 = vector.load %arg8[%c0_110, %c131_111] : memref<2x512xf32, #tpu.memory_space<vmem>>, vector<2x256xf32>
    %c13_i32_112 = arith.constant 13 : i32
    %202 = vector.broadcast %c13_i32_112 : i32 to vector<1x256xi32>
    %203 = arith.cmpi slt, %4, %202 : vector<1x256xi32>
    %cst_113 = arith.constant 0xFF800000 : f32
    %204 = vector.shape_cast %203 : vector<1x256xi1> to vector<1x256xi1>
    %205 = vector.broadcast %204 : vector<1x256xi1> to vector<2x256xi1>
    %206 = vector.broadcast %cst_113 : f32 to vector<2x256xf32>
    %207 = arith.select %205, %201, %206 : vector<2x256xi1>, vector<2x256xf32>
    %208 = arith.maximumf %200, %207 : vector<2x256xf32>
    %c0_114 = arith.constant 0 : index
    %c125_115 = arith.constant 125 : index
    %209 = vector.load %arg8[%c0_114, %c125_115] : memref<2x512xf32, #tpu.memory_space<vmem>>, vector<2x256xf32>
    %c3_i32_116 = arith.constant 3 : i32
    %210 = vector.broadcast %c3_i32_116 : i32 to vector<1x256xi32>
    %211 = arith.cmpi sge, %4, %210 : vector<1x256xi32>
    %cst_117 = arith.constant 0xFF800000 : f32
    %212 = vector.shape_cast %211 : vector<1x256xi1> to vector<1x256xi1>
    %213 = vector.broadcast %212 : vector<1x256xi1> to vector<2x256xi1>
    %214 = vector.broadcast %cst_117 : f32 to vector<2x256xf32>
    %215 = arith.select %213, %209, %214 : vector<2x256xi1>, vector<2x256xf32>
    %216 = arith.maximumf %208, %215 : vector<2x256xf32>
    %c0_118 = arith.constant 0 : index
    %c132_119 = arith.constant 132 : index
    %217 = vector.load %arg8[%c0_118, %c132_119] : memref<2x512xf32, #tpu.memory_space<vmem>>, vector<2x256xf32>
    %c12_i32_120 = arith.constant 12 : i32
    %218 = vector.broadcast %c12_i32_120 : i32 to vector<1x256xi32>
    %219 = arith.cmpi slt, %4, %218 : vector<1x256xi32>
    %cst_121 = arith.constant 0xFF800000 : f32
    %220 = vector.shape_cast %219 : vector<1x256xi1> to vector<1x256xi1>
    %221 = vector.broadcast %220 : vector<1x256xi1> to vector<2x256xi1>
    %222 = vector.broadcast %cst_121 : f32 to vector<2x256xf32>
    %223 = arith.select %221, %217, %222 : vector<2x256xi1>, vector<2x256xf32>
    %224 = arith.maximumf %216, %223 : vector<2x256xf32>
    %c0_122 = arith.constant 0 : index
    %c124_123 = arith.constant 124 : index
    %225 = vector.load %arg8[%c0_122, %c124_123] : memref<2x512xf32, #tpu.memory_space<vmem>>, vector<2x256xf32>
    %c4_i32_124 = arith.constant 4 : i32
    %226 = vector.broadcast %c4_i32_124 : i32 to vector<1x256xi32>
    %227 = arith.cmpi sge, %4, %226 : vector<1x256xi32>
    %cst_125 = arith.constant 0xFF800000 : f32
    %228 = vector.shape_cast %227 : vector<1x256xi1> to vector<1x256xi1>
    %229 = vector.broadcast %228 : vector<1x256xi1> to vector<2x256xi1>
    %230 = vector.broadcast %cst_125 : f32 to vector<2x256xf32>
    %231 = arith.select %229, %225, %230 : vector<2x256xi1>, vector<2x256xf32>
    %232 = arith.maximumf %224, %231 : vector<2x256xf32>
    %c0_126 = arith.constant 0 : index
    %c133 = arith.constant 133 : index
    %233 = vector.load %arg8[%c0_126, %c133] : memref<2x512xf32, #tpu.memory_space<vmem>>, vector<2x256xf32>
    %c11_i32 = arith.constant 11 : i32
    %234 = vector.broadcast %c11_i32 : i32 to vector<1x256xi32>
    %235 = arith.cmpi slt, %4, %234 : vector<1x256xi32>
    %cst_127 = arith.constant 0xFF800000 : f32
    %236 = vector.shape_cast %235 : vector<1x256xi1> to vector<1x256xi1>
    %237 = vector.broadcast %236 : vector<1x256xi1> to vector<2x256xi1>
    %238 = vector.broadcast %cst_127 : f32 to vector<2x256xf32>
    %239 = arith.select %237, %233, %238 : vector<2x256xi1>, vector<2x256xf32>
    %240 = arith.maximumf %232, %239 : vector<2x256xf32>
    %c0_128 = arith.constant 0 : index
    %c123 = arith.constant 123 : index
    %241 = vector.load %arg8[%c0_128, %c123] : memref<2x512xf32, #tpu.memory_space<vmem>>, vector<2x256xf32>
    %c5_i32 = arith.constant 5 : i32
    %242 = vector.broadcast %c5_i32 : i32 to vector<1x256xi32>
    %243 = arith.cmpi sge, %4, %242 : vector<1x256xi32>
    %cst_129 = arith.constant 0xFF800000 : f32
    %244 = vector.shape_cast %243 : vector<1x256xi1> to vector<1x256xi1>
    %245 = vector.broadcast %244 : vector<1x256xi1> to vector<2x256xi1>
    %246 = vector.broadcast %cst_129 : f32 to vector<2x256xf32>
    %247 = arith.select %245, %241, %246 : vector<2x256xi1>, vector<2x256xf32>
    %248 = arith.maximumf %240, %247 : vector<2x256xf32>
    %c0_130 = arith.constant 0 : index
    %c134 = arith.constant 134 : index
    %249 = vector.load %arg8[%c0_130, %c134] : memref<2x512xf32, #tpu.memory_space<vmem>>, vector<2x256xf32>
    %c10_i32 = arith.constant 10 : i32
    %250 = vector.broadcast %c10_i32 : i32 to vector<1x256xi32>
    %251 = arith.cmpi slt, %4, %250 : vector<1x256xi32>
    %cst_131 = arith.constant 0xFF800000 : f32
    %252 = vector.shape_cast %251 : vector<1x256xi1> to vector<1x256xi1>
    %253 = vector.broadcast %252 : vector<1x256xi1> to vector<2x256xi1>
    %254 = vector.broadcast %cst_131 : f32 to vector<2x256xf32>
    %255 = arith.select %253, %249, %254 : vector<2x256xi1>, vector<2x256xf32>
    %256 = arith.maximumf %248, %255 : vector<2x256xf32>
    %c0_132 = arith.constant 0 : index
    %c122 = arith.constant 122 : index
    %257 = vector.load %arg8[%c0_132, %c122] : memref<2x512xf32, #tpu.memory_space<vmem>>, vector<2x256xf32>
    %c6_i32 = arith.constant 6 : i32
    %258 = vector.broadcast %c6_i32 : i32 to vector<1x256xi32>
    %259 = arith.cmpi sge, %4, %258 : vector<1x256xi32>
    %cst_133 = arith.constant 0xFF800000 : f32
    %260 = vector.shape_cast %259 : vector<1x256xi1> to vector<1x256xi1>
    %261 = vector.broadcast %260 : vector<1x256xi1> to vector<2x256xi1>
    %262 = vector.broadcast %cst_133 : f32 to vector<2x256xf32>
    %263 = arith.select %261, %257, %262 : vector<2x256xi1>, vector<2x256xf32>
    %264 = arith.maximumf %256, %263 : vector<2x256xf32>
    %c0_134 = arith.constant 0 : index
    %c0_135 = arith.constant 0 : index
    %265 = vector.load %arg5[%c0_134, %c0_135] : memref<8x8xbf16, #tpu.memory_space<vmem>>, vector<8x8xbf16>
    %266 = vector.extract_strided_slice %265 {offsets = [0, 0], sizes = [8, 2], strides = [1, 1]} : vector<8x8xbf16> to vector<8x2xbf16>
    %267 = arith.truncf %18 : vector<2x256xf32> to vector<2x256xbf16>
    %cst_136 = arith.constant dense<0.000000e+00> : vector<8x256xf32>
    %268 = tpu.matmul %266, %267, %cst_136 {dimension_numbers = #tpu.dot_dimension_numbers<[1], [0], [0], [1], [0, 0, 1, 1], [], []>} : vector<8x2xbf16>, vector<2x256xbf16>, vector<8x256xf32> -> vector<8x256xf32>
    %269 = vector.extract_strided_slice %265 {offsets = [0, 2], sizes = [8, 2], strides = [1, 1]} : vector<8x8xbf16> to vector<8x2xbf16>
    %270 = arith.truncf %60 : vector<2x256xf32> to vector<2x256xbf16>
    %cst_137 = arith.constant dense<0.000000e+00> : vector<8x256xf32>
    %271 = tpu.matmul %269, %270, %cst_137 {dimension_numbers = #tpu.dot_dimension_numbers<[1], [0], [0], [1], [0, 0, 1, 1], [], []>} : vector<8x2xbf16>, vector<2x256xbf16>, vector<8x256xf32> -> vector<8x256xf32>
    %272 = arith.addf %268, %271 : vector<8x256xf32>
    %273 = vector.extract_strided_slice %265 {offsets = [0, 4], sizes = [8, 2], strides = [1, 1]} : vector<8x8xbf16> to vector<8x2xbf16>
    %274 = arith.truncf %142 : vector<2x256xf32> to vector<2x256xbf16>
    %cst_138 = arith.constant dense<0.000000e+00> : vector<8x256xf32>
    %275 = tpu.matmul %273, %274, %cst_138 {dimension_numbers = #tpu.dot_dimension_numbers<[1], [0], [0], [1], [0, 0, 1, 1], [], []>} : vector<8x2xbf16>, vector<2x256xbf16>, vector<8x256xf32> -> vector<8x256xf32>
    %276 = arith.addf %272, %275 : vector<8x256xf32>
    %277 = vector.extract_strided_slice %265 {offsets = [0, 6], sizes = [8, 2], strides = [1, 1]} : vector<8x8xbf16> to vector<8x2xbf16>
    %278 = arith.truncf %264 : vector<2x256xf32> to vector<2x256xbf16>
    %cst_139 = arith.constant dense<0.000000e+00> : vector<8x256xf32>
    %279 = tpu.matmul %277, %278, %cst_139 {dimension_numbers = #tpu.dot_dimension_numbers<[1], [0], [0], [1], [0, 0, 1, 1], [], []>} : vector<8x2xbf16>, vector<2x256xbf16>, vector<8x256xf32> -> vector<8x256xf32>
    %280 = arith.addf %276, %279 : vector<8x256xf32>
    %c0_140 = arith.constant 0 : index
    %c0_141 = arith.constant 0 : index
    %281 = vector.load %arg6[%c0_140, %c0_141] : memref<8x1xf32, #tpu.memory_space<vmem>>, vector<8x1xf32>
    %282 = vector.broadcast %281 : vector<8x1xf32> to vector<8x256xf32>
    %283 = arith.addf %280, %282 : vector<8x256xf32>
    %cst_142 = arith.constant 0.000000e+00 : f32
    %284 = vector.broadcast %cst_142 : f32 to vector<8x256xf32>
    %285 = arith.subf %284, %283 : vector<8x256xf32>
    %286 = math.exp %285 : vector<8x256xf32>
    %cst_143 = arith.constant 1.000000e+00 : f32
    %287 = vector.broadcast %cst_143 : f32 to vector<8x256xf32>
    %288 = arith.addf %287, %286 : vector<8x256xf32>
    %289 = tpu.reciprocal %288 {approx = true} : vector<8x256xf32> -> vector<8x256xf32>
    %290 = arith.mulf %283, %289 : vector<8x256xf32>
    %c0_144 = arith.constant 0 : index
    %c0_145 = arith.constant 0 : index
    %c0_146 = arith.constant 0 : index
    %291 = vector.load %arg7[%c0_144, %c0_145, %c0_146] : memref<1x8x256xf32, #tpu.memory_space<vmem>>, vector<1x8x256xf32>
    %292 = vector.shape_cast %291 : vector<1x8x256xf32> to vector<8x256xf32>
    %293 = vector.shape_cast %290 : vector<8x256xf32> to vector<1x8x256xf32>
    tpu.vector_store %arg7[%c0_144, %c0_145, %c0_146], %293 {strides = array<i32>} : memref<1x8x256xf32, #tpu.memory_space<vmem>>, vector<1x8x256xf32>,
    return
  }
  func.func @transform_0(%arg0: i32) -> (i32, i32) {
    %c0_i32 = arith.constant 0 : i32
    %c0_i32_0 = arith.constant 0 : i32
    %c0_i32_1 = arith.constant 0 : i32
    return %c0_i32, %c0_i32_0 : i32, i32
  }
  func.func @transform_1(%arg0: i32) -> (i32, i32, i32) {
    %c0_i32 = arith.constant 0 : i32
    %c0_i32_0 = arith.constant 0 : i32
    %c0_i32_1 = arith.constant 0 : i32
    return %arg0, %c0_i32, %c0_i32_0 : i32, i32, i32
  }
  func.func @transform_2(%arg0: i32) -> (i32, i32) {
    %c0_i32 = arith.constant 0 : i32
    %c0_i32_0 = arith.constant 0 : i32
    %c0_i32_1 = arith.constant 0 : i32
    return %c0_i32, %c0_i32_0 : i32, i32
  }
  func.func @transform_3(%arg0: i32) -> (i32, i32) {
    %c0_i32 = arith.constant 0 : i32
    %c0_i32_0 = arith.constant 0 : i32
    %c0_i32_1 = arith.constant 0 : i32
    return %c0_i32, %c0_i32_0 : i32, i32
  }
  func.func @transform_4(%arg0: i32) -> (i32, i32) {
    %c0_i32 = arith.constant 0 : i32
    %c0_i32_0 = arith.constant 0 : i32
    %c0_i32_1 = arith.constant 0 : i32
    return %c0_i32, %c0_i32_0 : i32, i32
  }
  func.func @transform_5(%arg0: i32) -> (i32, i32) {
    %c0_i32 = arith.constant 0 : i32
    %c0_i32_0 = arith.constant 0 : i32
    %c0_i32_1 = arith.constant 0 : i32
    return %c0_i32, %c0_i32_0 : i32, i32
  }
  func.func @transform_6(%arg0: i32) -> (i32, i32, i32) {
    %c0_i32 = arith.constant 0 : i32
    %c0_i32_0 = arith.constant 0 : i32
    %c0_i32_1 = arith.constant 0 : i32
    return %arg0, %c0_i32, %c0_i32_0 : i32, i32, i32
  }
}

</mosaic_0001>

<bundles_post_ra>
// kernel: tpu_custom_call.1
= control target key start
LH: loop header
LB: loop body
LE: loop exit
PB: predicated region body
PF: predicated region fallthrough
CT: control target
= control target key end

     0   :  { %11 = vsyncpa [#allocation4], 0  ;;  %s2751_s0 = inlined_call_operand.vmem [shape: s32[1,256], index: 0, kind: input, shape index: {}]   ;;  %s2752_s1 = inlined_call_operand.vmem [shape: bf16[2,4,256], index: 1, kind: input, shape index: {}]   ;;  %s2753_s2 = inlined_call_operand.vmem [shape: bf16[2,4], index: 2, kind: input, shape index: {}]   ;;  %s2754_s3 = inlined_call_operand.vmem [shape: f32[2,1], index: 3, kind: input, shape index: {}]   ;;  %s2755_s4 = inlined_call_operand.vmem [shape: bf16[8,8], index: 4, kind: input, shape index: {}]   ;;  %s2756_s5 = inlined_call_operand.vmem [shape: f32[8,1], index: 5, kind: input, shape index: {}]   ;;  %s2757_s6 = inlined_call_operand.hbm [shape: f32[2,8,256], index: 6, kind: output, shape index: {}]  }
   0x1   :  { %13 = vsyncpa [#allocation4 + $0x1], 0  ;;  %s2033_s21 = smov 0   ;;  %s2035_s22 = smov 0  }
   0x2   :  { %s2037_s23 = smov 0   ;;  %s2039_s24 = smov 0  }
   0x3 LB: > { %s2054_s25 = sadd.s32 4294967295, %s1973_s24   ;;  %s1728_s26 = sadd.s32 4294967294, %s1973_s24   ;;  %s1973_s24 = sphi %s2039_s24, %s2897_s24   ;;  %s1969_s23 = sphi %s2037_s23, %s2896_s23   ;;  %s1965_s22 = sphi %s2035_s22, %s2895_s22   ;;  %s1961_s21 = sphi %s2033_s21, %s2894_s21  }
   0x4   : > { %s2058_s27 = sadd.s32 1, %s1973_s24   ;;  %s157_s28 = sadd.s32 1, %s1969_s23 }
   0x5   : > { %s154_s29 = ssub.s32 %s1973_s24, %s2058_s27  ;;  %p167_p0 = scmp.ne.s32.totalorder %s1969_s23, %s1965_s22 }
   0x6   : > { %p155_p1 = scmp.eq.s32.totalorder %s154_s29, 0  ;;  %p168_p2 = scmp.eq.s32.totalorder %s2054_s25, 1 }
   0x7   : > { %p173_p3 = scmp.ne.s32.totalorder %s1965_s22, %s1961_s21  ;;  %p174_p4 = scmp.eq.s32.totalorder %s1728_s26, 1 }
   0x8   : > { %s2069_s30 = scalar_select %p155_p1, %s1969_s23, %s157_s28  }
   0x9   : > { %p2071_p5 = por %p168_p2, %p167_p0  ;;  %p2075_p6 = por %p174_p4, %p173_p3 }
   0xa   : > { %p1731_p7 = scmp.ge.s32.totalorder %s1973_s24, 1  ;;  %p215_p8 = scmp.lt.s32.totalorder %s1973_s24, 3 }
   0xc   : > { %p216_p9 = pnand %p1731_p7, %p215_p8 }
   0xd   : > { %p245_p10 = scmp.lt.s32.totalorder (!%p216_p9), %s2054_s25, 1  ;;  %v1975_v0 = vmov (!%p216_p9), 0   ;;  %v256_v1 = vld [vmem:[%s2754_s3] sm:$0x3] (!%p216_p9)  ;;  %vm275_vm0 = vcmask (!%p216_p9), 1041408   ;;  %vm2758_vm1 = vcmask (!%p216_p9), 31744   ;;  %v353_v28 = vlaneseq (!%p216_p9) }
   0xe   : > { %219 = sbr.rel (%p216_p9) target bundleno = 1579 (0x62b), region = 44  ;;  %314 = vmatprep.mubr.bf16.mxu0 (!%p216_p9), %v1975_v0  ;;  %1821 = vset.pattern.permute.xlu0 (!%p216_p9), %v1975_v0  ;;  %v254_v5 = vld [vmem:[%s2753_s2] sm:$0x1] (!%p216_p9)  ;;  %v1976_v6 = vmov (!%p216_p9), -inf   ;;  %vm2760_vm2 = vcmask (!%p216_p9), 1040384   ;;  %s1978_s18 = smov (!%p216_p9), 96  }
   0xf   : > { %259 = vperm.xlu0 (!%p216_p9), %1821, %v256_v1   ;;  %1461 = vmatprep.mubr.bf16.mxu1 (!%p216_p9), %v1975_v0  ;;  %252 = vst [vmem:[#allocation2 + $0x6] sm:$0x3] (!%p216_p9), %v1976_v6  ;;  %251 = vst [vmem:[#allocation2] sm:$0x3] (!%p216_p9), %v1976_v6  ;;  %v1977_v26 = vmov (!%p216_p9), 1983009808  }
  0x10   : > { %v351_v27 = vunpack.c.l.s4 (!%p216_p9), %v1977_v26  ;;  %v2109_v34 = vshrl.u32 (!%p216_p9), %v353_v28, 7  ;;  %s1979_s19 = smov (!%p216_p9), 112   ;;  %s1980_s20 = smov (!%p216_p9), 16   ;;  %vm2762_vm3 = vcmask (!%p216_p9), 916480   ;;  %vm2761_vm4 = vcmask (!%p216_p9), 130048  }
  0x11   : > { %s1981_s26 = smov (!%p216_p9), 32   ;;  %vm2767_vm5 = vcmask (!%p216_p9), 785408   ;;  %vm2766_vm6 = vcmask (!%p216_p9), 261120   ;;  %s1982_s28 = smov (!%p216_p9), 1   ;;  %vm2768_vm10 = vcmask (!%p216_p9), 1039360   ;;  %vm2759_vm14 = vcmask (!%p216_p9), 7168  }
  0x12   : > { %v352_v33 = vunpack.c.0.s8 (!%p216_p9), %v351_v27  ;;  %s1983_s29 = smov (!%p216_p9), 127   ;;  %s1984_s9 = smov (!%p216_p9), 2   ;;  %v2172_v26 = vsub.s32 (!%p216_p9), 1, %v2109_v34 }
  0x13   : > { %s1985_s10 = smov (!%p216_p9), 126   ;;  %s1986_s13 = smov (!%p216_p9), 48  }
  0x14   : > { %v2112_v35 = vsub.s32 (!%p216_p9), %v352_v33, %v2109_v34  ;;  %s1987_s14 = smov (!%p216_p9), 80   ;;  %s1989_s16 = smov (!%p216_p9), 3  }
  0x15   : > { %s246_s11 = scalar_select %p245_p10, %s2054_s25, 1 }
  0x16   : > { %s1990_s17 = smov 125  }
  0x17   : > { %s1758_s12 = sshll.u32 %s246_s11, 2  ;;  %s1991_s11 = smov 4  }
  0x18   : > { %s249_s15 = scalar_lea.vmem %s2752_s1, %s1758_s12  ;;  %s1992_s12 = smov 124  }
  0x19   : > { %v1735_v2 = vld.sshfl [vmem:[%s249_s15] sm:$0x33 pattern:$0x76325410]  ;;  %s1988_s15 = smov 64  }
  0x1a   : > { %v270_v3 = vcombine.high %v1735_v2, %v1735_v2  ;;  %v277_v4 = vsel %vm275_vm0, %v1735_v2, 0 }
  0x1c   : > { %1736 = vmatprep.subr.msk.bf16.mxu0 %vm275_vm0, %v270_v3 }
  0x1d   : > { %283 = vmatpush1.bf16.msra.mxu0 %v277_v4 }
  0x20   : > { %1737 = vmatmul.mubr.msk.bf16.vlgmr.msra.gmra.mrb[0].mxu0 %vm2758_vm1, %v254_v5 }
  0x21   : > { %1511 = vmatprep.mubr.bf16.mxu0 %v1975_v0 }
  0x8e   : > { %v260_v7 = vpop.permute.xlu0 %259 }
  0xf3   : > { %v316_v8 = vpop.f32.mrb[0].mxu0 }
  0xf4   : > { %v317_v9 = vadd.f32 %v316_v8, %v260_v7  ;;  %v318_v10 = vpop.f32.mrb[1].mxu0 }
  0xf5   : > { %v319_v11 = vadd.f32 %v318_v10, %v260_v7  ;;  %v320_v12 = vpop.f32.mrb[2].mxu0 }
  0xf6   : > { %v323_v13 = vsub.f32 0.0, %v317_v9  ;;  %v321_v14 = vpop.f32.mrb[3].mxu0 }
  0xf7   : > { %v324_v15 = vsub.f32 0.0, %v319_v11 }
  0xf8   : > { %v325_v16 = vmul.f32 1.442695, %v323_v13 }
  0xf9   : > { %v327_v17 = vmul.f32 1.442695, %v324_v15 }
  0xfa   : > { %1894 = vpow2.f32 %v325_v16 }
  0xfb   : > { %1896 = vpow2.f32 %v327_v17 }
 0x104   : > { %v1895_v18 = vpop.eup %1894 }
 0x105   : > { %v1897_v19 = vpop.eup %1896  ;;  %v329_v20 = vadd.f32 1.0, %v1895_v18 }
 0x106   : > { %v330_v21 = vadd.f32 1.0, %v1897_v19 }
 0x107   : > { %1898 = vrcp.f32 %v329_v20 }
 0x108   : > { %1900 = vrcp.f32 %v330_v21 }
 0x111   : > { %v1899_v22 = vpop.eup %1898 }
 0x112   : > { %v1901_v23 = vpop.eup %1900  ;;  %v2097_v24 = vmul.f32 %v1899_v22, %v317_v9  ;;  %v2165_v22 = vld [vmem:[%s2751_s0] sm:$0x3] }
 0x113   : > { %v2099_v25 = vmul.f32 %v1901_v23, %v319_v11  ;;  %vm448_vm7 = vcmp.lt.s32.totalorder %v2165_v22, 15  ;;  %vm493_vm8 = vcmp.ge.s32.totalorder %v2165_v22, 1  ;;  %vm537_vm9 = vcmp.lt.s32.totalorder %v2165_v22, 14 }
 0x114   : > { %v1410_v29 = vpack.c.bf16 %v2097_v24, %v2097_v24  ;;  %v449_v27 = vsel %vm448_vm7, 1, %v1975_v0  ;;  %vm564_vm11 = vcmp.ge.s32.totalorder %v2165_v22, 2  ;;  %vm2770_vm7 = vcmask 1031168  }
 0x115   : > { %v337_v30 = vcombine.low %v2097_v24, %v2099_v25  ;;  %v1411_v31 = vpack.c.bf16 %v2099_v25, %v2099_v25 }
 0x116   : > { %v1474_v32 = vsel %vm2760_vm2, %v1410_v29, 0 }
 0x117   : > { %1738 = vst.sshfl [vmem:[#allocation2 + $0x2] sm:$0x33 pattern:$0x76325410] %v337_v30  ;;  %1747 = vmatprep.subr.msk.bf16.mxu0 %vm2760_vm2, %v1411_v31  ;;  %v457_v31 = vrot.slane %v449_v27, %v2172_v26 }
 0x118   : > { %1480 = vmatpush1.bf16.msra.mxu0 %v1474_v32  ;;  %v494_v32 = vsel %vm493_vm8, 1, %v1975_v0 }
 0x119   : > { %vm2188_vm13 = vcmp.eq.s32.totalorder %v457_v31, 1 }
 0x11e   : > { %v347_v36 = vld [vmem:[#allocation2 + $0x2] sm:$0x3f] }
 0x11f   : > { %v356_v37 = vrot.slane %v347_v36, %v2112_v35  ;;  %v378_v38 = vld [vmem:[#allocation2] sm:$0x3f]  ;;  %v349_v41 = vcombine.high %v347_v36, %v347_v36 }
 0x120   : > { %v387_v39 = vrot.slane %v378_v38, %v2112_v35  ;;  %v380_v43 = vcombine.high %v378_v38, %v378_v38  ;;  %v502_v38 = vrot.slane %v494_v32, %v2172_v26 }
 0x121   : > { %409 = vrot.lane.b32.xlu1 %v356_v37, %s1978_s18  ;;  %365 = vrot.lane.b32.xlu0 %v356_v37, %s1979_s19  ;;  %v364_v40 = vcombine.high %v356_v37, %v356_v37  ;;  %v363_v42 = vrot.slane %v349_v41, %v2112_v35 }
 0x122   : > { %v394_v44 = vrot.slane %v380_v43, %v2112_v35  ;;  %v395_v45 = vcombine.high %v387_v39, %v387_v39  ;;  %vm2201_vm0 = vcmp.eq.s32.totalorder %v502_v38, 1 }
 0x125   : > { %396 = vrot.lane.b32.xlu0 %v387_v39, %s1980_s20  ;;  %367 = vrot.lane.b32.xlu1 %v364_v40, %s1979_s19 }
 0x129   : > { %422 = vrot.lane.b32.xlu0 %v387_v39, %s1981_s26  ;;  %369 = vrot.lane.b32.xlu1 %v363_v42, %s1979_s19 }
 0x12d   : > { %400 = vrot.lane.b32.xlu0 %v394_v44, %s1980_s20  ;;  %398 = vrot.lane.b32.xlu1 %v395_v45, %s1980_s20 }
 0x131   : > { %411 = vrot.lane.b32.xlu0 %v364_v40, %s1978_s18  ;;  %413 = vrot.lane.b32.xlu1 %v363_v42, %s1978_s18 }
 0x135   : > { %426 = vrot.lane.b32.xlu0 %v394_v44, %s1981_s26  ;;  %424 = vrot.lane.b32.xlu1 %v395_v45, %s1981_s26 }
 0x193   : > { %v410_v46 = vpop.permute.xlu1 %409  ;;  %v366_v47 = vpop.permute.xlu0 %365 }
 0x197   : > { %v397_v48 = vpop.permute.xlu0 %396  ;;  %v368_v49 = vpop.permute.xlu1 %367 }
 0x198   : > { %v372_v54 = vsel %vm2762_vm3, %v366_v47, %v368_v49  ;;  %v565_v47 = vsel %vm564_vm11, 1, %v1975_v0  ;;  %vm2769_vm11 = vcmask 15360  }
 0x199   : > { %v376_v58 = vmax.f32 %v2097_v24, %v372_v54 }
 0x19b   : > { %v423_v50 = vpop.permute.xlu0 %422  ;;  %v370_v51 = vpop.permute.xlu1 %369 }
 0x19c   : > { %v373_v55 = vsel %vm2762_vm3, %v368_v49, %v370_v51 }
 0x19d   : > { %v377_v59 = vmax.f32 %v2099_v25, %v373_v55  ;;  %v2169_v25 = vsub.s32 0, %v2109_v34  ;;  %v538_v34 = vsel %vm537_vm9, 1, %v1975_v0  ;;  %v2791_v55 = vmov 0 }
 0x19e   : > { %v546_v44 = vrot.slane %v538_v34, %v2172_v26 }
 0x19f   : > { %v401_v52 = vpop.permute.xlu0 %400  ;;  %v399_v53 = vpop.permute.xlu1 %398  ;;  %v453_v30 = vrot.slane %v449_v27, %v2169_v25  ;;  %v498_v37 = vrot.slane %v494_v32, %v2169_v25  ;;  %v542_v43 = vrot.slane %v538_v34, %v2169_v25 }
 0x1a0   : > { %v403_v56 = vsel %vm2761_vm4, %v397_v48, %v399_v53  ;;  %v404_v57 = vsel %vm2761_vm4, %v399_v53, %v401_v52  ;;  %vm2215_vm9 = vcmp.eq.s32.totalorder %v546_v44, 1 }
 0x1a1   : > { %v407_v1 = vmax.f32 %v376_v58, %v403_v56  ;;  %v408_v2 = vmax.f32 %v377_v59, %v404_v57  ;;  %vm2184_vm12 = vcmp.eq.s32.totalorder %v453_v30, 1  ;;  %vm2197_vm15 = vcmp.eq.s32.totalorder %v498_v37, 1 }
 0x1a2   : > { %vm2211_vm8 = vcmp.eq.s32.totalorder %v542_v43, 1  ;;  %v2792_v55 = vsel %vm2215_vm9, 4294967295, %v2791_v55  ;;  %v569_v56 = vrot.slane %v565_v47, %v2169_v25  ;;  %v573_v57 = vrot.slane %v565_v47, %v2172_v26 }
 0x1a3   : > { %v412_v60 = vpop.permute.xlu0 %411  ;;  %v414_v61 = vpop.permute.xlu1 %413 }
 0x1a4   : > { %v416_v62 = vsel %vm2767_vm5, %v410_v46, %v412_v60  ;;  %v417_v63 = vsel %vm2767_vm5, %v412_v60, %v414_v61  ;;  %vm2233_vm1 = vcmp.eq.s32.totalorder %v569_v56, 1 }
 0x1a5   : > { %v420_v3 = vmax.f32 %v407_v1, %v416_v62  ;;  %v421_v4 = vmax.f32 %v408_v2, %v417_v63 }
 0x1a7   : > { %v427_v5 = vpop.permute.xlu0 %426  ;;  %v425_v6 = vpop.permute.xlu1 %424 }
 0x1a8   : > { %v429_v7 = vsel %vm2766_vm6, %v423_v50, %v425_v6  ;;  %v430_v8 = vsel %vm2766_vm6, %v425_v6, %v427_v5 }
 0x1a9   : > { %v2140_v9 = vmax.f32 %v420_v3, %v429_v7  ;;  %v2142_v10 = vmax.f32 %v421_v4, %v430_v8 }
 0x1ab   : > { %v437_v11 = vcombine.low %v2140_v9, %v2142_v10 }
 0x1ad   : > { %1739 = vst.sshfl [vmem:[#allocation2 + $0x2] sm:$0x33 pattern:$0x76325410] %v437_v11 }
 0x1b4   : > { %v492_v12 = vld [vmem:[#allocation2] sm:$0x3f] }
 0x1b5   : > { %v447_v13 = vld [vmem:[#allocation2 + $0x2] sm:$0x3f]  ;;  %v513_v14 = vrot.slane %v492_v12, %v2112_v35  ;;  %v506_v19 = vcombine.high %v492_v12, %v492_v12 }
 0x1b6   : > { %v468_v15 = vrot.slane %v447_v13, %v2112_v35  ;;  %v461_v16 = vcombine.high %v447_v13, %v447_v13 }
 0x1b7   : > { %522 = vrot.lane.b32.xlu0 %v513_v14, %s1982_s28  ;;  %v520_v20 = vrot.slane %v506_v19, %v2112_v35  ;;  %v521_v21 = vcombine.high %v513_v14, %v513_v14 }
 0x1b8   : > { %477 = vrot.lane.b32.xlu1 %v468_v15, %s1983_s29  ;;  %v476_v17 = vcombine.high %v468_v15, %v468_v15  ;;  %v475_v18 = vrot.slane %v461_v16, %v2112_v35 }
 0x1bb   : > { %576 = vrot.lane.b32.xlu0 %v513_v14, %s1984_s9 }
 0x1bc   : > { %549 = vrot.lane.b32.xlu1 %v468_v15, %s1985_s10 }
 0x1bf   : > { %479 = vrot.lane.b32.xlu0 %v476_v17, %s1983_s29 }
 0x1c0   : > { %481 = vrot.lane.b32.xlu1 %v475_v18, %s1983_s29 }
 0x1c3   : > { %526 = vrot.lane.b32.xlu0 %v520_v20, %s1982_s28 }
 0x1c4   : > { %524 = vrot.lane.b32.xlu1 %v521_v21, %s1982_s28 }
 0x1c7   : > { %551 = vrot.lane.b32.xlu0 %v476_v17, %s1985_s10 }
 0x1c8   : > { %553 = vrot.lane.b32.xlu1 %v475_v18, %s1985_s10 }
 0x1cb   : > { %580 = vrot.lane.b32.xlu0 %v520_v20, %s1984_s9 }
 0x1cc   : > { %578 = vrot.lane.b32.xlu1 %v521_v21, %s1984_s9 }
 0x229   : > { %v523_v23 = vpop.permute.xlu0 %522 }
 0x22a   : > { %v478_v24 = vpop.permute.xlu1 %477 }
 0x22d   : > { %v577_v28 = vpop.permute.xlu0 %576 }
 0x22e   : > { %v550_v29 = vpop.permute.xlu1 %549 }
 0x231   : > { %v480_v33 = vpop.permute.xlu0 %479 }
 0x232   : > { %v482_v36 = vpop.permute.xlu1 %481  ;;  %v484_v41 = vsel %vm2768_vm10, %v478_v24, %v480_v33 }
 0x233   : > { %v485_v42 = vsel %vm2768_vm10, %v480_v33, %v482_v36  ;;  %v488_v52 = vsel %vm2184_vm12, %v484_v41, -inf }
 0x234   : > { %v489_v53 = vsel %vm2188_vm13, %v485_v42, -inf  ;;  %v490_v62 = vmax.f32 %v2140_v9, %v488_v52 }
 0x235   : > { %v527_v45 = vpop.permute.xlu0 %526  ;;  %v491_v63 = vmax.f32 %v2142_v10, %v489_v53 }
 0x236   : > { %v525_v46 = vpop.permute.xlu1 %524 }
 0x237   : > { %v529_v50 = vsel %vm2759_vm14, %v523_v23, %v525_v46  ;;  %v530_v51 = vsel %vm2759_vm14, %v525_v46, %v527_v45  ;;  %vm2237_vm14 = vcmp.eq.s32.totalorder %v573_v57, 1 }
 0x238   : > { %v533_v58 = vsel %vm2197_vm15, %v529_v50, -inf  ;;  %v534_v59 = vsel %vm2201_vm0, %v530_v51, -inf }
 0x239   : > { %v552_v60 = vpop.permute.xlu0 %551  ;;  %v535_v5 = vmax.f32 %v490_v62, %v533_v58  ;;  %v536_v6 = vmax.f32 %v491_v63, %v534_v59 }
 0x23a   : > { %v554_v61 = vpop.permute.xlu1 %553  ;;  %v556_v1 = vsel %vm2770_vm7, %v550_v29, %v552_v60 }
 0x23b   : > { %v557_v2 = vsel %vm2770_vm7, %v552_v60, %v554_v61  ;;  %v560_v3 = vsel %vm2211_vm8, %v556_v1, -inf }
 0x23c   : > { %v561_v4 = vsel %vm2215_vm9, %v557_v2, -inf  ;;  %v562_v11 = vmax.f32 %v535_v5, %v560_v3 }
 0x23d   : > { %v581_v9 = vpop.permute.xlu0 %580  ;;  %v563_v12 = vmax.f32 %v536_v6, %v561_v4 }
 0x23e   : > { %v579_v10 = vpop.permute.xlu1 %578 }
 0x23f   : > { %v583_v13 = vsel %vm2769_vm11, %v577_v28, %v579_v10  ;;  %v584_v14 = vsel %vm2769_vm11, %v579_v10, %v581_v9  ;;  %vm2807_vm11 = vcmask 15360  }
 0x240   : > { %v587_v15 = vsel %vm2233_vm1, %v583_v13, -inf  ;;  %v588_v16 = vsel %vm2237_vm14, %v584_v14, -inf }
 0x241   : > { %v2247_v17 = vmax.f32 %v562_v11, %v587_v15  ;;  %v2249_v18 = vmax.f32 %v563_v12, %v588_v16 }
 0x243   : > { %v593_v19 = vcombine.low %v2247_v17, %v2249_v18  ;;  %v1413_v20 = vpack.c.bf16 %v2249_v18, %v2249_v18  ;;  %v1412_v21 = vpack.c.bf16 %v2247_v17, %v2247_v17 }
 0x245   : > { %1740 = vst.sshfl [vmem:[#allocation2 + $0x2] sm:$0x33 pattern:$0x76325410] %v593_v19  ;;  %1745 = vmatprep.subr.msk.bf16.mxu1 %vm2760_vm2, %v1413_v20  ;;  %v1424_v23 = vsel %vm2760_vm2, %v1412_v21, 0  ;;  %vm2765_vm2 = vcmask 654336  }
 0x246   : > { %1430 = vmatpush1.bf16.msra.mxu1 %v1424_v23 }
 0x24c   : > { %v633_v24 = vld [vmem:[#allocation2] sm:$0x3f] }
 0x24d   : > { %v603_v27 = vld [vmem:[#allocation2 + $0x2] sm:$0x3f]  ;;  %v642_v28 = vrot.slane %v633_v24, %v2112_v35  ;;  %v635_v33 = vcombine.high %v633_v24, %v633_v24 }
 0x24e   : > { %v612_v29 = vrot.slane %v603_v27, %v2112_v35  ;;  %v605_v30 = vcombine.high %v603_v27, %v603_v27 }
 0x24f   : > { %651 = vrot.lane.b32.xlu0 %v642_v28, %s1980_s20  ;;  %v649_v36 = vrot.slane %v635_v33, %v2112_v35  ;;  %v650_v34 = vcombine.high %v642_v28, %v642_v28 }
 0x250   : > { %621 = vrot.lane.b32.xlu1 %v612_v29, %s1979_s19  ;;  %v620_v31 = vcombine.high %v612_v29, %v612_v29  ;;  %v619_v32 = vrot.slane %v605_v30, %v2112_v35 }
 0x253   : > { %675 = vrot.lane.b32.xlu0 %v642_v28, %s1981_s26 }
 0x254   : > { %663 = vrot.lane.b32.xlu1 %v612_v29, %s1978_s18 }
 0x257   : > { %700 = vrot.lane.b32.xlu0 %v642_v28, %s1986_s13 }
 0x258   : > { %687 = vrot.lane.b32.xlu1 %v612_v29, %s1987_s14 }
 0x25b   : > { %726 = vrot.lane.b32.xlu0 %v642_v28, %s1988_s15 }
 0x25c   : > { %713 = vrot.lane.b32.xlu1 %v612_v29, %s1988_s15 }
 0x25f   : > { %623 = vrot.lane.b32.xlu0 %v620_v31, %s1979_s19 }
 0x260   : > { %625 = vrot.lane.b32.xlu1 %v619_v32, %s1979_s19 }
 0x263   : > { %655 = vrot.lane.b32.xlu0 %v649_v36, %s1980_s20 }
 0x264   : > { %653 = vrot.lane.b32.xlu1 %v650_v34, %s1980_s20 }
 0x267   : > { %665 = vrot.lane.b32.xlu0 %v620_v31, %s1978_s18 }
 0x268   : > { %667 = vrot.lane.b32.xlu1 %v619_v32, %s1978_s18 }
 0x26b   : > { %679 = vrot.lane.b32.xlu0 %v649_v36, %s1981_s26 }
 0x26c   : > { %677 = vrot.lane.b32.xlu1 %v650_v34, %s1981_s26 }
 0x26f   : > { %689 = vrot.lane.b32.xlu0 %v620_v31, %s1987_s14 }
 0x270   : > { %691 = vrot.lane.b32.xlu1 %v619_v32, %s1987_s14 }
 0x273   : > { %704 = vrot.lane.b32.xlu0 %v649_v36, %s1986_s13 }
 0x274   : > { %702 = vrot.lane.b32.xlu1 %v650_v34, %s1986_s13 }
 0x277   : > { %715 = vrot.lane.b32.xlu0 %v620_v31, %s1988_s15 }
 0x278   : > { %717 = vrot.lane.b32.xlu1 %v619_v32, %s1988_s15 }
 0x27b   : > { %730 = vrot.lane.b32.xlu0 %v649_v36, %s1988_s15 }
 0x27c   : > { %728 = vrot.lane.b32.xlu1 %v650_v34, %s1988_s15 }
 0x2c1   : > { %v652_v37 = vpop.permute.xlu0 %651 }
 0x2c2   : > { %v622_v38 = vpop.permute.xlu1 %621 }
 0x2c5   : > { %v676_v41 = vpop.permute.xlu0 %675 }
 0x2c6   : > { %v664_v42 = vpop.permute.xlu1 %663 }
 0x2c9   : > { %v701_v43 = vpop.permute.xlu0 %700 }
 0x2ca   : > { %v688_v44 = vpop.permute.xlu1 %687 }
 0x2cd   : > { %v727_v45 = vpop.permute.xlu0 %726 }
 0x2ce   : > { %v714_v46 = vpop.permute.xlu1 %713 }
 0x2d1   : > { %v624_v47 = vpop.permute.xlu0 %623 }
 0x2d2   : > { %v626_v50 = vpop.permute.xlu1 %625  ;;  %v627_v59 = vsel %vm2762_vm3, %v622_v38, %v624_v47 }
 0x2d3   : > { %v628_v60 = vsel %vm2762_vm3, %v624_v47, %v626_v50  ;;  %v631_v63 = vmax.f32 %v2247_v17, %v627_v59  ;;  %vm2763_vm3 = vcmask 523264  }
 0x2d4   : > { %v632_v1 = vmax.f32 %v2249_v18, %v628_v60 }
 0x2d5   : > { %v656_v51 = vpop.permute.xlu0 %655 }
 0x2d6   : > { %v654_v52 = vpop.permute.xlu1 %653 }
 0x2d7   : > { %v657_v61 = vsel %vm2761_vm4, %v652_v37, %v654_v52  ;;  %v658_v62 = vsel %vm2761_vm4, %v654_v52, %v656_v51  ;;  %vm2764_vm4 = vcmask 392192  }
 0x2d8   : > { %v661_v6 = vmax.f32 %v631_v63, %v657_v61  ;;  %v662_v9 = vmax.f32 %v632_v1, %v658_v62 }
 0x2d9   : > { %v666_v53 = vpop.permute.xlu0 %665 }
 0x2da   : > { %v668_v56 = vpop.permute.xlu1 %667  ;;  %v669_v4 = vsel %vm2767_vm5, %v664_v42, %v666_v53 }
 0x2db   : > { %v670_v5 = vsel %vm2767_vm5, %v666_v53, %v668_v56  ;;  %v673_v12 = vmax.f32 %v661_v6, %v669_v4  ;;  %vm2772_vm5 = vcmask 1022976  }
 0x2dc   : > { %v674_v13 = vmax.f32 %v662_v9, %v670_v5 }
 0x2dd   : > { %v680_v57 = vpop.permute.xlu0 %679 }
 0x2de   : > { %v678_v58 = vpop.permute.xlu1 %677 }
 0x2df   : > { %v681_v10 = vsel %vm2766_vm6, %v676_v41, %v678_v58  ;;  %v682_v11 = vsel %vm2766_vm6, %v678_v58, %v680_v57 }
 0x2e0   : > { %v685_v18 = vmax.f32 %v673_v12, %v681_v10  ;;  %v686_v19 = vmax.f32 %v674_v13, %v682_v11 }
 0x2e1   : > { %v690_v2 = vpop.permute.xlu0 %689 }
 0x2e2   : > { %v692_v3 = vpop.permute.xlu1 %691  ;;  %v694_v16 = vsel %vm2765_vm2, %v688_v44, %v690_v2 }
 0x2e3   : > { %v695_v17 = vsel %vm2765_vm2, %v690_v2, %v692_v3  ;;  %v698_v23 = vmax.f32 %v685_v18, %v694_v16  ;;  %vm2797_vm2 = vcmask 7168  }
 0x2e4   : > { %v699_v24 = vmax.f32 %v686_v19, %v695_v17  ;;  %vm2798_vm6 = vmmov %vm2797_vm2 }
 0x2e5   : > { %v705_v14 = vpop.permute.xlu0 %704 }
 0x2e6   : > { %v703_v15 = vpop.permute.xlu1 %702 }
 0x2e7   : > { %v707_v20 = vsel %vm2764_vm4, %v701_v43, %v703_v15  ;;  %v708_v21 = vsel %vm2764_vm4, %v703_v15, %v705_v14  ;;  %vm869_vm4 = vcmp.ge.s32.totalorder %v2165_v22, 3 }
 0x2e8   : > { %v711_v31 = vmax.f32 %v698_v23, %v707_v20  ;;  %v712_v32 = vmax.f32 %v699_v24, %v708_v21  ;;  %v870_v13 = vsel %vm869_vm4, 1, %v1975_v0 }
 0x2e9   : > { %v716_v27 = vpop.permute.xlu0 %715  ;;  %v874_v18 = vrot.slane %v870_v13, %v2169_v25  ;;  %v878_v21 = vrot.slane %v870_v13, %v2172_v26  ;;  %v2813_v13 = vmov 0 }
 0x2ea   : > { %v718_v28 = vpop.permute.xlu1 %717  ;;  %v720_v29 = vsel %vm2763_vm3, %v714_v46, %v716_v27 }
 0x2eb   : > { %v721_v30 = vsel %vm2763_vm3, %v716_v27, %v718_v28  ;;  %v724_v33 = vmax.f32 %v711_v31, %v720_v29 }
 0x2ec   : > { %v725_v36 = vmax.f32 %v712_v32, %v721_v30 }
 0x2ed   : > { %v731_v34 = vpop.permute.xlu0 %730 }
 0x2ee   : > { %v729_v37 = vpop.permute.xlu1 %728 }
 0x2ef   : > { %v732_v38 = vsel %vm2763_vm3, %v727_v45, %v729_v37  ;;  %v733_v41 = vsel %vm2763_vm3, %v729_v37, %v731_v34  ;;  %vm842_vm3 = vcmp.lt.s32.totalorder %v2165_v22, 13 }
 0x2f0   : > { %v2305_v42 = vmax.f32 %v724_v33, %v732_v38  ;;  %v2307_v43 = vmax.f32 %v725_v36, %v733_v41  ;;  %v843_v10 = vsel %vm842_vm3, 1, %v1975_v0  ;;  %vm896_vm3 = vcmp.lt.s32.totalorder %v2165_v22, 12 }
 0x2f1   : > { %v847_v14 = vrot.slane %v843_v10, %v2169_v25  ;;  %v851_v15 = vrot.slane %v843_v10, %v2172_v26  ;;  %v2803_v33 = vmov 0  ;;  %v897_v36 = vsel %vm896_vm3, 1, %v1975_v0  ;;  %vm2808_vm3 = vmmov %vm2807_vm11 }
 0x2f2   : > { %v740_v44 = vcombine.low %v2305_v42, %v2307_v43 }
 0x2f3   : > { %vm2356_vm4 = vcmp.eq.s32.totalorder %v847_v14, 1 }
 0x2f4   : > { %1741 = vst.sshfl [vmem:[#allocation2 + $0x2] sm:$0x33 pattern:$0x76325410] %v740_v44  ;;  %v2805_v44 = vmov 0 }
 0x2fb   : > { %v782_v46 = vld [vmem:[#allocation2] sm:$0x3f] }
 0x2fc   : > { %v750_v47 = vld [vmem:[#allocation2 + $0x2] sm:$0x3f]  ;;  %v791_v50 = vrot.slane %v782_v46, %v2112_v35  ;;  %v784_v56 = vcombine.high %v782_v46, %v782_v46 }
 0x2fd   : > { %v759_v51 = vrot.slane %v750_v47, %v2112_v35  ;;  %v752_v45 = vcombine.high %v750_v47, %v750_v47 }
 0x2fe   : > { %800 = vrot.lane.b32.xlu0 %v791_v50, %s1982_s28  ;;  %v798_v57 = vrot.slane %v784_v56, %v2112_v35  ;;  %v799_v58 = vcombine.high %v791_v50, %v791_v50  ;;  %v905_v56 = vrot.slane %v897_v36, %v2172_v26 }
 0x2ff   : > { %768 = vrot.lane.b32.xlu1 %v759_v51, %s1983_s29  ;;  %v767_v52 = vcombine.high %v759_v51, %v759_v51  ;;  %v766_v53 = vrot.slane %v752_v45, %v2112_v35 }
 0x302   : > { %828 = vrot.lane.b32.xlu0 %v791_v50, %s1984_s9 }
 0x303   : > { %814 = vrot.lane.b32.xlu1 %v759_v51, %s1985_s10 }
 0x306   : > { %881 = vrot.lane.b32.xlu0 %v791_v50, %s1989_s16 }
 0x307   : > { %854 = vrot.lane.b32.xlu1 %v759_v51, %s1990_s17 }
 0x30a   : > { %935 = vrot.lane.b32.xlu0 %v791_v50, %s1991_s11 }
 0x30b   : > { %908 = vrot.lane.b32.xlu1 %v759_v51, %s1992_s12 }
 0x30e   : > { %770 = vrot.lane.b32.xlu0 %v767_v52, %s1983_s29 }
 0x30f   : > { %772 = vrot.lane.b32.xlu1 %v766_v53, %s1983_s29 }
 0x312   : > { %804 = vrot.lane.b32.xlu0 %v798_v57, %s1982_s28 }
 0x313   : > { %802 = vrot.lane.b32.xlu1 %v799_v58, %s1982_s28 }
 0x316   : > { %816 = vrot.lane.b32.xlu0 %v767_v52, %s1985_s10 }
 0x317   : > { %818 = vrot.lane.b32.xlu1 %v766_v53, %s1985_s10 }
 0x31a   : > { %832 = vrot.lane.b32.xlu0 %v798_v57, %s1984_s9 }
 0x31b   : > { %830 = vrot.lane.b32.xlu1 %v799_v58, %s1984_s9 }
 0x31e   : > { %856 = vrot.lane.b32.xlu0 %v767_v52, %s1990_s17 }
 0x31f   : > { %858 = vrot.lane.b32.xlu1 %v766_v53, %s1990_s17 }
 0x322   : > { %885 = vrot.lane.b32.xlu0 %v798_v57, %s1989_s16 }
 0x323   : > { %883 = vrot.lane.b32.xlu1 %v799_v58, %s1989_s16 }
 0x326   : > { %910 = vrot.lane.b32.xlu0 %v767_v52, %s1992_s12 }
 0x327   : > { %912 = vrot.lane.b32.xlu1 %v766_v53, %s1992_s12  ;;  %v901_v53 = vrot.slane %v897_v36, %v2169_v25  ;;  %v2817_v36 = vmov 0 }
 0x32a   : > { %939 = vrot.lane.b32.xlu0 %v798_v57, %s1991_s11 }
 0x32b   : > { %937 = vrot.lane.b32.xlu1 %v799_v58, %s1991_s11 }
 0x370   : > { %v801_v59 = vpop.permute.xlu0 %800 }
 0x371   : > { %v769_v60 = vpop.permute.xlu1 %768 }
 0x374   : > { %v829_v61 = vpop.permute.xlu0 %828 }
 0x375   : > { %v815_v62 = vpop.permute.xlu1 %814 }
 0x378   : > { %v882_v63 = vpop.permute.xlu0 %881 }
 0x379   : > { %v855_v1 = vpop.permute.xlu1 %854 }
 0x37c   : > { %v2339_v2 = vpop.permute.xlu0 %935 }
 0x37d   : > { %v2341_v3 = vpop.permute.xlu1 %908 }
 0x380   : > { %v771_v4 = vpop.permute.xlu0 %770 }
 0x381   : > { %v773_v5 = vpop.permute.xlu1 %772  ;;  %v774_v16 = vsel %vm2768_vm10, %v769_v60, %v771_v4 }
 0x382   : > { %v775_v17 = vsel %vm2768_vm10, %v771_v4, %v773_v5  ;;  %v778_v28 = vsel %vm2184_vm12, %v774_v16, -inf  ;;  %vm2364_vm10 = vcmp.eq.s32.totalorder %v851_v15, 1 }
 0x383   : > { %v779_v29 = vsel %vm2188_vm13, %v775_v17, -inf  ;;  %v780_v46 = vmax.f32 %v2305_v42, %v778_v28 }
 0x384   : > { %v805_v6 = vpop.permute.xlu0 %804  ;;  %v781_v47 = vmax.f32 %v2307_v43, %v779_v29 }
 0x385   : > { %v803_v9 = vpop.permute.xlu1 %802 }
 0x386   : > { %v806_v23 = vsel %vm2797_vm2, %v801_v59, %v803_v9  ;;  %v807_v24 = vsel %vm2798_vm6, %v803_v9, %v805_v6  ;;  %vm2370_vm2 = vcmp.eq.s32.totalorder %v874_v18, 1  ;;  %vm2379_vm6 = vcmp.eq.s32.totalorder %v878_v21, 1 }
 0x387   : > { %v2804_v33 = vsel %vm2370_vm2, 4294967295, %v2803_v33  ;;  %v810_v34 = vsel %vm2197_vm15, %v806_v23, -inf  ;;  %v811_v37 = vsel %vm2201_vm0, %v807_v24, -inf  ;;  %v2806_v44 = vsel %vm2379_vm6, 4294967295, %v2805_v44 }
 0x388   : > { %v817_v11 = vpop.permute.xlu0 %816  ;;  %v812_v57 = vmax.f32 %v780_v46, %v810_v34  ;;  %v813_v58 = vmax.f32 %v781_v47, %v811_v37  ;;  %v2819_v34 = vmov 0 }
 0x389   : > { %v819_v12 = vpop.permute.xlu1 %818  ;;  %v820_v31 = vsel %vm2770_vm7, %v815_v62, %v817_v11 }
 0x38a   : > { %v821_v32 = vsel %vm2770_vm7, %v817_v11, %v819_v12  ;;  %vm923_vm7 = vcmp.ge.s32.totalorder %v2165_v22, 4  ;;  %v824_v45 = vsel %vm2211_vm8, %v820_v31, -inf  ;;  %v2811_v12 = vmov 0 }
 0x38b   : > { %v825_v52 = vsel %vm2215_vm9, %v821_v32, -inf  ;;  %v924_v4 = vsel %vm923_vm7, 1, %v1975_v0  ;;  %v826_v5 = vmax.f32 %v812_v57, %v824_v45  ;;  %vm2815_vm7 = vcmask 1014784  }
 0x38c   : > { %v833_v19 = vpop.permute.xlu0 %832  ;;  %v827_v6 = vmax.f32 %v813_v58, %v825_v52  ;;  %v932_v15 = vrot.slane %v924_v4, %v2172_v26 }
 0x38d   : > { %v831_v20 = vpop.permute.xlu1 %830 }
 0x38e   : > { %v834_v50 = vsel %vm2807_vm11, %v829_v61, %v831_v20  ;;  %v835_v51 = vsel %vm2808_vm3, %v831_v20, %v833_v19  ;;  %vm2809_vm3 = vcmask 23552   ;;  %vm2413_vm11 = vcmp.eq.s32.totalorder %v905_v56, 1 }
 0x38f   : > { %v838_v59 = vsel %vm2233_vm1, %v834_v50, -inf  ;;  %v839_v60 = vsel %vm2237_vm14, %v835_v51, -inf  ;;  %vm2810_vm9 = vmmov %vm2809_vm3  ;;  %v2814_v13 = vsel %vm2413_vm11, 4294967295, %v2813_v13 }
 0x390   : > { %v857_v38 = vpop.permute.xlu0 %856  ;;  %v840_v22 = vmax.f32 %v826_v5, %v838_v59  ;;  %v841_v14 = vmax.f32 %v827_v6, %v839_v60 }
 0x391   : > { %v859_v41 = vpop.permute.xlu1 %858  ;;  %v861_v42 = vsel %vm2772_vm5, %v855_v1, %v857_v38 }
 0x392   : > { %v862_v43 = vsel %vm2772_vm5, %v857_v38, %v859_v41  ;;  %v865_v10 = vsel %vm2356_vm4, %v861_v42, -inf  ;;  %vm2409_vm5 = vcmp.eq.s32.totalorder %v901_v53, 1 }
 0x393   : > { %v866_v11 = vsel %vm2364_vm10, %v862_v43, -inf  ;;  %v2812_v12 = vsel %vm2409_vm5, 4294967295, %v2811_v12  ;;  %v867_v20 = vmax.f32 %v840_v22, %v865_v10  ;;  %v2497_v10 = vld [vmem:[%s2755_s4] sm:$0xf] }
 0x394   : > { %v886_v61 = vpop.permute.xlu0 %885  ;;  %v868_v21 = vmax.f32 %v841_v14, %v866_v11 }
 0x395   : > { %v884_v62 = vpop.permute.xlu1 %883 }
 0x396   : > { %v888_v9 = vsel %vm2809_vm3, %v882_v63, %v884_v62  ;;  %v889_v1 = vsel %vm2810_vm9, %v884_v62, %v886_v61  ;;  %v928_v63 = vrot.slane %v924_v4, %v2169_v25  ;;  %vm2816_vm9 = vmmov %vm2815_vm7 }
 0x397   : > { %v892_v16 = vsel %vm2370_vm2, %v888_v9, -inf  ;;  %v893_v17 = vsel %vm2379_vm6, %v889_v1, -inf  ;;  %vm2434_vm6 = vcmp.eq.s32.totalorder %v932_v15, 1  ;;  %vm2831_vm2 = vcmask 261120  }
 0x398   : > { %v911_v18 = vpop.permute.xlu0 %910  ;;  %v894_v31 = vmax.f32 %v867_v20, %v892_v16  ;;  %v895_v32 = vmax.f32 %v868_v21, %v893_v17  ;;  %vm2430_vm3 = vcmp.eq.s32.totalorder %v928_v63, 1  ;;  %v2820_v34 = vsel %vm2434_vm6, 4294967295, %v2819_v34 }
 0x399   : > { %v913_v19 = vpop.permute.xlu1 %912  ;;  %v915_v23 = vsel %vm2815_vm7, %v2341_v3, %v911_v18  ;;  %v2818_v36 = vsel %vm2430_vm3, 4294967295, %v2817_v36  ;;  %vm2821_vm7 = vcmask 31744  }
 0x39a   : > { %v916_v24 = vsel %vm2816_vm9, %v911_v18, %v913_v19  ;;  %v919_v28 = vsel %vm2409_vm5, %v915_v23, -inf  ;;  %vm2822_vm9 = vmmov %vm2821_vm7 }
 0x39b   : > { %v920_v29 = vsel %vm2413_vm11, %v916_v24, -inf  ;;  %v921_v38 = vmax.f32 %v894_v31, %v919_v28  ;;  %vm2829_vm11 = vcmask 785408  }
 0x39c   : > { %v940_v37 = vpop.permute.xlu0 %939  ;;  %v922_v41 = vmax.f32 %v895_v32, %v920_v29  ;;  %vm2830_vm5 = vmmov %vm2829_vm11 }
 0x39d   : > { %v938_v3 = vpop.permute.xlu1 %937 }
 0x39e   : > { %v941_v46 = vsel %vm2821_vm7, %v2339_v2, %v938_v3  ;;  %v942_v47 = vsel %vm2822_vm9, %v938_v3, %v940_v37  ;;  %vm2823_vm7 = vcmask 1040384   ;;  %vm2824_vm9 = vcmask 15360  }
 0x39f   : > { %v945_v50 = vsel %vm2430_vm3, %v941_v46, -inf  ;;  %v946_v51 = vsel %vm2434_vm6, %v942_v47, -inf  ;;  %1748 = vmatmul.mubr.msk.bf16.vlgmr.msra.gmra.mrb[4].mxu0 %vm2824_vm9, %v2497_v10  ;;  %vm2827_vm6 = vcmask 130048  }
 0x3a0   : > { %v2445_v45 = vmax.f32 %v921_v38, %v945_v50  ;;  %v2447_v52 = vmax.f32 %v922_v41, %v946_v51  ;;  %1621 = vmatprep.mubr.bf16.mxu0 %v1975_v0  ;;  %vm2828_vm3 = vmmov %vm2827_vm6 }
 0x3a2   : > { %v951_v53 = vcombine.low %v2445_v45, %v2447_v52  ;;  %v1521_v56 = vpack.c.bf16 %v2447_v52, %v2447_v52 }
 0x3a4   : > { %1742 = vst.sshfl [vmem:[#allocation2 + $0x2] sm:$0x33 pattern:$0x76325410] %v951_v53  ;;  %1749 = vmatprep.subr.msk.bf16.mxu1 %vm2823_vm7, %v1521_v56  ;;  %vm2825_vm7 = vcmask 916480  }
 0x3a5   : > { %vm2826_vm9 = vmmov %vm2825_vm7 }
 0x3ab   : > { %v991_v2 = vld [vmem:[#allocation2] sm:$0x3f] }
 0x3ac   : > { %v961_v57 = vld [vmem:[#allocation2 + $0x2] sm:$0x3f]  ;;  %v1000_v58 = vrot.slane %v991_v2, %v2112_v35  ;;  %v993_v61 = vcombine.high %v991_v2, %v991_v2 }
 0x3ad   : > { %v970_v42 = vrot.slane %v961_v57, %v2112_v35  ;;  %v963_v43 = vcombine.high %v961_v57, %v961_v57 }
 0x3ae   : > { %1009 = vrot.lane.b32.xlu0 %v1000_v58, %s1980_s20  ;;  %v1007_v62 = vrot.slane %v993_v61, %v2112_v35  ;;  %v1008_v4 = vcombine.high %v1000_v58, %v1000_v58 }
 0x3af   : > { %979 = vrot.lane.b32.xlu1 %v970_v42, %s1979_s19  ;;  %v978_v59 = vcombine.high %v970_v42, %v970_v42  ;;  %v977_v60 = vrot.slane %v963_v43, %v2112_v35 }
 0x3b2   : > { %1033 = vrot.lane.b32.xlu0 %v1000_v58, %s1981_s26 }
 0x3b3   : > { %1021 = vrot.lane.b32.xlu1 %v970_v42, %s1978_s18 }
 0x3b6   : > { %1057 = vrot.lane.b32.xlu0 %v1000_v58, %s1986_s13 }
 0x3b7   : > { %1045 = vrot.lane.b32.xlu1 %v970_v42, %s1987_s14 }
 0x3ba   : > { %1081 = vrot.lane.b32.xlu0 %v1000_v58, %s1988_s15 }
 0x3bb   : > { %1069 = vrot.lane.b32.xlu1 %v970_v42, %s1988_s15 }
 0x3be   : > { %1105 = vrot.lane.b32.xlu0 %v1000_v58, %s1987_s14 }
 0x3bf   : > { %1093 = vrot.lane.b32.xlu1 %v970_v42, %s1986_s13 }
 0x3c2   : > { %1129 = vrot.lane.b32.xlu0 %v1000_v58, %s1978_s18 }
 0x3c3   : > { %1117 = vrot.lane.b32.xlu1 %v970_v42, %s1981_s26 }
 0x3c6   : > { %981 = vrot.lane.b32.xlu0 %v978_v59, %s1979_s19 }
 0x3c7   : > { %983 = vrot.lane.b32.xlu1 %v977_v60, %s1979_s19 }
 0x3ca   : > { %1013 = vrot.lane.b32.xlu0 %v1007_v62, %s1980_s20 }
 0x3cb   : > { %1011 = vrot.lane.b32.xlu1 %v1008_v4, %s1980_s20 }
 0x3ce   : > { %1023 = vrot.lane.b32.xlu0 %v978_v59, %s1978_s18 }
 0x3cf   : > { %1025 = vrot.lane.b32.xlu1 %v977_v60, %s1978_s18 }
 0x3d2   : > { %1037 = vrot.lane.b32.xlu0 %v1007_v62, %s1981_s26 }
 0x3d3   : > { %1035 = vrot.lane.b32.xlu1 %v1008_v4, %s1981_s26 }
 0x3d6   : > { %1047 = vrot.lane.b32.xlu0 %v978_v59, %s1987_s14 }
 0x3d7   : > { %1049 = vrot.lane.b32.xlu1 %v977_v60, %s1987_s14 }
 0x3da   : > { %1061 = vrot.lane.b32.xlu0 %v1007_v62, %s1986_s13 }
 0x3db   : > { %1059 = vrot.lane.b32.xlu1 %v1008_v4, %s1986_s13 }
 0x3de   : > { %1071 = vrot.lane.b32.xlu0 %v978_v59, %s1988_s15 }
 0x3df   : > { %1073 = vrot.lane.b32.xlu1 %v977_v60, %s1988_s15 }
 0x3e2   : > { %1085 = vrot.lane.b32.xlu0 %v1007_v62, %s1988_s15 }
 0x3e3   : > { %1083 = vrot.lane.b32.xlu1 %v1008_v4, %s1988_s15 }
 0x3e6   : > { %1095 = vrot.lane.b32.xlu0 %v978_v59, %s1986_s13 }
 0x3e7   : > { %1097 = vrot.lane.b32.xlu1 %v977_v60, %s1986_s13 }
 0x3ea   : > { %1109 = vrot.lane.b32.xlu0 %v1007_v62, %s1987_s14 }
 0x3eb   : > { %1107 = vrot.lane.b32.xlu1 %v1008_v4, %s1987_s14 }
 0x3ee   : > { %1119 = vrot.lane.b32.xlu0 %v978_v59, %s1981_s26 }
 0x3ef   : > { %1121 = vrot.lane.b32.xlu1 %v977_v60, %s1981_s26  ;;  %s1994_s26 = smov 5  }
 0x3f2   : > { %1133 = vrot.lane.b32.xlu0 %v1007_v62, %s1978_s18 }
 0x3f3   : > { %1131 = vrot.lane.b32.xlu1 %v1008_v4, %s1978_s18  ;;  %s1993_s18 = smov 123  }
 0x420   : > { %v1010_v5 = vpop.permute.xlu0 %1009 }
 0x421   : > { %v980_v6 = vpop.permute.xlu1 %979 }
 0x424   : > { %v1034_v9 = vpop.permute.xlu0 %1033 }
 0x425   : > { %v1022_v1 = vpop.permute.xlu1 %1021 }
 0x428   : > { %v1058_v11 = vpop.permute.xlu0 %1057 }
 0x429   : > { %v1046_v22 = vpop.permute.xlu1 %1045 }
 0x42c   : > { %v1082_v14 = vpop.permute.xlu0 %1081 }
 0x42d   : > { %v1070_v63 = vpop.permute.xlu1 %1069 }
 0x430   : > { %v1106_v15 = vpop.permute.xlu0 %1105 }
 0x431   : > { %v1094_v16 = vpop.permute.xlu1 %1093 }
 0x434   : > { %v2502_v17 = vpop.permute.xlu0 %1129 }
 0x435   : > { %v1118_v18 = vpop.permute.xlu1 %1117 }
 0x438   : > { %v982_v19 = vpop.permute.xlu0 %981 }
 0x439   : > { %v984_v20 = vpop.permute.xlu1 %983  ;;  %v985_v41 = vsel %vm2825_vm7, %v980_v6, %v982_v19  ;;  %vm2832_vm7 = vmmov %vm2831_vm2 }
 0x43a   : > { %v986_v46 = vsel %vm2826_vm9, %v982_v19, %v984_v20  ;;  %v989_v51 = vmax.f32 %v2445_v45, %v985_v41  ;;  %vm2835_vm9 = vcmask 392192  }
 0x43b   : > { %v990_v53 = vmax.f32 %v2447_v52, %v986_v46 }
 0x43c   : > { %v1014_v21 = vpop.permute.xlu0 %1013 }
 0x43d   : > { %v1012_v23 = vpop.permute.xlu1 %1011 }
 0x43e   : > { %v1015_v47 = vsel %vm2827_vm6, %v1010_v5, %v1012_v23  ;;  %v1016_v50 = vsel %vm2828_vm3, %v1012_v23, %v1014_v21  ;;  %vm2833_vm6 = vcmask 654336  }
 0x43f   : > { %v1019_v42 = vmax.f32 %v989_v51, %v1015_v47  ;;  %v1020_v43 = vmax.f32 %v990_v53, %v1016_v50  ;;  %vm2834_vm3 = vmmov %vm2833_vm6 }
 0x440   : > { %v1024_v24 = vpop.permute.xlu0 %1023 }
 0x441   : > { %v1026_v28 = vpop.permute.xlu1 %1025  ;;  %v1027_v57 = vsel %vm2829_vm11, %v1022_v1, %v1024_v24  ;;  %vm2836_vm11 = vmmov %vm2835_vm9 }
 0x442   : > { %v1028_v58 = vsel %vm2830_vm5, %v1024_v24, %v1026_v28  ;;  %v1031_v61 = vmax.f32 %v1019_v42, %v1027_v57  ;;  %vm2837_vm5 = vcmask 523264  }
 0x443   : > { %v1032_v62 = vmax.f32 %v1020_v43, %v1028_v58 }
 0x444   : > { %v1038_v29 = vpop.permute.xlu0 %1037 }
 0x445   : > { %v1036_v31 = vpop.permute.xlu1 %1035 }
 0x446   : > { %v1039_v59 = vsel %vm2831_vm2, %v1034_v9, %v1036_v31  ;;  %v1040_v60 = vsel %vm2832_vm7, %v1036_v31, %v1038_v29  ;;  %vm2838_vm2 = vmmov %vm2837_vm5 }
 0x447   : > { %v1043_v19 = vmax.f32 %v1031_v61, %v1039_v59  ;;  %v1044_v20 = vmax.f32 %v1032_v62, %v1040_v60  ;;  %vm2839_vm7 = vmmov %vm2838_vm2 }
 0x448   : > { %v1048_v32 = vpop.permute.xlu0 %1047 }
 0x449   : > { %v1050_v37 = vpop.permute.xlu1 %1049  ;;  %v1051_v6 = vsel %vm2833_vm6, %v1046_v22, %v1048_v32  ;;  %vm2840_vm6 = vmmov %vm2838_vm2 }
 0x44a   : > { %v1052_v52 = vsel %vm2834_vm3, %v1048_v32, %v1050_v37  ;;  %v1055_v23 = vmax.f32 %v1043_v19, %v1051_v6  ;;  %vm2841_vm3 = vmmov %vm2835_vm9 }
 0x44b   : > { %v1056_v24 = vmax.f32 %v1044_v20, %v1052_v52 }
 0x44c   : > { %v1062_v3 = vpop.permute.xlu0 %1061 }
 0x44d   : > { %v1060_v38 = vpop.permute.xlu1 %1059 }
 0x44e   : > { %v1063_v1 = vsel %vm2835_vm9, %v1058_v11, %v1060_v38  ;;  %v1064_v21 = vsel %vm2836_vm11, %v1060_v38, %v1062_v3  ;;  %vm2842_vm9 = vmmov %vm2841_vm3  ;;  %vm2843_vm11 = vcmask 654336  }
 0x44f   : > { %v1067_v41 = vmax.f32 %v1055_v23, %v1063_v1  ;;  %v1068_v46 = vmax.f32 %v1056_v24, %v1064_v21 }
 0x450   : > { %v1072_v56 = vpop.permute.xlu0 %1071 }
 0x451   : > { %v1074_v2 = vpop.permute.xlu1 %1073  ;;  %v1075_v29 = vsel %vm2837_vm5, %v1070_v63, %v1072_v56  ;;  %vm2844_vm5 = vmmov %vm2843_vm11 }
 0x452   : > { %v1076_v31 = vsel %vm2838_vm2, %v1072_v56, %v1074_v2  ;;  %v1079_v37 = vmax.f32 %v1067_v41, %v1075_v29  ;;  %vm2845_vm2 = vcmask 261120  }
 0x453   : > { %v1080_v47 = vmax.f32 %v1068_v46, %v1076_v31  ;;  %v1632_v46 = vld [vmem:[%s2756_s5] sm:$0xff] }
 0x454   : > { %v1086_v4 = vpop.permute.xlu0 %1085 }
 0x455   : > { %v1084_v5 = vpop.permute.xlu1 %1083 }
 0x456   : > { %v1087_v22 = vsel %vm2839_vm7, %v1082_v14, %v1084_v5  ;;  %v1088_v32 = vsel %vm2840_vm6, %v1084_v5, %v1086_v4  ;;  %vm2846_vm7 = vmmov %vm2845_vm2  ;;  %vm2847_vm6 = vcmask 785408  }
 0x457   : > { %v1091_v51 = vmax.f32 %v1079_v37, %v1087_v22  ;;  %v1092_v53 = vmax.f32 %v1080_v47, %v1088_v32 }
 0x458   : > { %v1096_v28 = vpop.permute.xlu0 %1095 }
 0x459   : > { %v1098_v9 = vpop.permute.xlu1 %1097  ;;  %v1099_v3 = vsel %vm2841_vm3, %v1094_v16, %v1096_v28  ;;  %vm2848_vm3 = vmmov %vm2847_vm6 }
 0x45a   : > { %v1100_v38 = vsel %vm2842_vm9, %v1096_v28, %v1098_v9  ;;  %v1103_v2 = vmax.f32 %v1091_v51, %v1099_v3 }
 0x45b   : > { %v1104_v57 = vmax.f32 %v1092_v53, %v1100_v38 }
 0x45c   : > { %v1110_v50 = vpop.permute.xlu0 %1109 }
 0x45d   : > { %v1108_v11 = vpop.permute.xlu1 %1107 }
 0x45e   : > { %v1111_v63 = vsel %vm2843_vm11, %v1106_v15, %v1108_v11  ;;  %v1112_v56 = vsel %vm2844_vm5, %v1108_v11, %v1110_v50  ;;  %vm2849_vm11 = vcmask 1039360  }
 0x45f   : > { %v1115_v59 = vmax.f32 %v1103_v2, %v1111_v63  ;;  %v1116_v60 = vmax.f32 %v1104_v57, %v1112_v56  ;;  %v2567_v63 = vld [vmem:[%s2751_s0] sm:$0x3]  ;;  %vm2850_vm5 = vmmov %vm2849_vm11 }
 0x460   : > { %v1120_v58 = vpop.permute.xlu0 %1119  ;;  %vm1301_vm9 = vcmp.lt.s32.totalorder %v2567_v63, 11 }
 0x461   : > { %v1122_v14 = vpop.permute.xlu1 %1121  ;;  %v1123_v42 = vsel %vm2845_vm2, %v1118_v18, %v1120_v58  ;;  %vm1328_vm2 = vcmp.ge.s32.totalorder %v2567_v63, 5 }
 0x462   : > { %v1124_v43 = vsel %vm2846_vm7, %v1120_v58, %v1122_v14  ;;  %v1127_v61 = vmax.f32 %v1115_v59, %v1123_v42  ;;  %vm2851_vm7 = vcmask 7168   ;;  %v1329_v40 = vsel %vm1328_vm2, 1, %v1975_v0 }
 0x463   : > { %v1128_v16 = vmax.f32 %v1116_v60, %v1124_v43  ;;  %v1302_v60 = vsel %vm1301_vm9, 1, %v1975_v0  ;;  %v1333_v48 = vrot.slane %v1329_v40, %v2169_v25  ;;  %v1337_v49 = vrot.slane %v1329_v40, %v2172_v26 }
 0x464   : > { %v1134_v62 = vpop.permute.xlu0 %1133  ;;  %v1306_v39 = vrot.slane %v1302_v60, %v2169_v25 }
 0x465   : > { %v1132_v4 = vpop.permute.xlu1 %1131 }
 0x466   : > { %v1135_v5 = vsel %vm2847_vm6, %v2502_v17, %v1132_v4  ;;  %v1136_v15 = vsel %vm2848_vm3, %v1132_v4, %v1134_v62  ;;  %vm2852_vm6 = vmmov %vm2851_vm7  ;;  %vm2855_vm3 = vcmask 15360  }
 0x467   : > { %v2531_v6 = vmax.f32 %v1127_v61, %v1135_v5  ;;  %v2533_v52 = vmax.f32 %v1128_v16, %v1136_v15  ;;  %vm2856_vm9 = vmmov %vm2855_vm3 }
 0x469   : > { %v1143_v18 = vcombine.low %v2531_v6, %v2533_v52 }
 0x46b   : > { %1743 = vst.sshfl [vmem:[#allocation2 + $0x2] sm:$0x33 pattern:$0x76325410] %v1143_v18 }
 0x472   : > { %v1153_v19 = vld [vmem:[#allocation2 + $0x2] sm:$0x3f] }
 0x473   : > { %v1185_v20 = vld [vmem:[#allocation2] sm:$0x3f]  ;;  %v1155_v1 = vcombine.high %v1153_v19, %v1153_v19  ;;  %v1162_v21 = vrot.slane %v1153_v19, %v2112_v35 }
 0x474   : > { %v1194_v23 = vrot.slane %v1185_v20, %v2112_v35  ;;  %v1187_v28 = vcombine.high %v1185_v20, %v1185_v20  ;;  %v1310_v20 = vrot.slane %v1302_v60, %v2172_v26 }
 0x475   : > { %v1169_v24 = vrot.slane %v1155_v1, %v2112_v35  ;;  %v1170_v17 = vcombine.high %v1162_v21, %v1162_v21 }
 0x476   : > { %v1202_v29 = vcombine.high %v1194_v23, %v1194_v23  ;;  %v1201_v31 = vrot.slane %v1187_v28, %v2112_v35  ;;  %v1744_v35 = vcombine.low %v2497_v10, %v2497_v10 }
 0x477   : > { %1175 = vrot.lane.b32.xlu0 %v1169_v24, %s1983_s29  ;;  %v1822_v9 = vpack.i.bf16 %v1170_v17, %v1162_v21 }
 0x478   : > { %v1827_v41 = vpack.i.bf16 %v1202_v29, %v1194_v23 }
 0x479   : > { %1823 = vrot.lane.b32.xlu1 %v1822_v9, %s1983_s29  ;;  %s1996_s29 = smov 6  }
 0x47b   : > { %1207 = vrot.lane.b32.xlu0 %v1201_v31, %s1982_s28 }
 0x47d   : > { %1828 = vrot.lane.b32.xlu1 %v1827_v41, %s1982_s28  ;;  %s1995_s28 = smov 122  }
 0x47f   : > { %1221 = vrot.lane.b32.xlu0 %v1169_v24, %s1985_s10 }
 0x481   : > { %1833 = vrot.lane.b32.xlu1 %v1822_v9, %s1985_s10 }
 0x483   : > { %1235 = vrot.lane.b32.xlu0 %v1201_v31, %s1984_s9 }
 0x485   : > { %1838 = vrot.lane.b32.xlu1 %v1827_v41, %s1984_s9 }
 0x487   : > { %1249 = vrot.lane.b32.xlu0 %v1169_v24, %s1990_s17 }
 0x489   : > { %1843 = vrot.lane.b32.xlu1 %v1822_v9, %s1990_s17  ;;  %s1759_s17 = sshll.u32 %s2054_s25, 8 }
 0x48b   : > { %1263 = vrot.lane.b32.xlu0 %v1201_v31, %s1989_s16 }
 0x48d   : > { %1848 = vrot.lane.b32.xlu1 %v1827_v41, %s1989_s16 }
 0x48f   : > { %1277 = vrot.lane.b32.xlu0 %v1169_v24, %s1992_s12 }
 0x491   : > { %1853 = vrot.lane.b32.xlu1 %v1822_v9, %s1992_s12 }
 0x493   : > { %1291 = vrot.lane.b32.xlu0 %v1201_v31, %s1991_s11 }
 0x495   : > { %1858 = vrot.lane.b32.xlu1 %v1827_v41, %s1991_s11 }
 0x497   : > { %1317 = vrot.lane.b32.xlu0 %v1169_v24, %s1993_s18 }
 0x499   : > { %1863 = vrot.lane.b32.xlu1 %v1822_v9, %s1993_s18  ;;  %s2709_s18 = scalar_lea.hbm %s2757_s6, %s1759_s17 }
 0x49b   : > { %1344 = vrot.lane.b32.xlu0 %v1201_v31, %s1994_s26 }
 0x49d   : > { %1868 = vrot.lane.b32.xlu1 %v1827_v41, %s1994_s26 }
 0x49f   : > { %1371 = vrot.lane.b32.xlu0 %v1169_v24, %s1995_s28 }
 0x4a1   : > { %1873 = vrot.lane.b32.xlu1 %v1822_v9, %s1995_s28 }
 0x4a3   : > { %1398 = vrot.lane.b32.xlu0 %v1201_v31, %s1996_s29 }
 0x4a5   : > { %1878 = vrot.lane.b32.xlu1 %v1827_v41, %s1996_s29 }
 0x4a7   : > { %1522 = vrot.lane.b32.xlu0 %v1744_v35, %s1992_s12 }
 0x4a9   : > { %1417 = vrot.lane.b32.xlu1 %v1744_v35, %s1985_s10  ;;  %s242_s10 = sand.u32 1, %s1965_s22  }
 0x4aa   : > { %s1732_s16 = sshll.u32 %s242_s10, 4  ;;  %s1655_s26 = scalar_lea.sflag [#allocation4], %s242_s10 }
 0x4ab   : > { %1635 = vperm.xlu0 %1821, %v1632_v46   ;;  %s244_s11 = scalar_lea.vmem [#allocation3], %s1732_s16 }
 0x4ac   : > { %s1669_s12 = sshll.u32 %s244_s11, 4  ;;  %s2711_s12 = int_to_ptr.vmem [resolvable:$true] %s1669_s12 }
 0x4ad   : > { %1578 = vrot.lane.b32.xlu1 %v1744_v35, %s1995_s28  ;;  %s1911_s25 = scalar_lea.vmem %s2711_s12, 256  ;;  %s1997_s28 = smov [#allocation3]  }
 0x4ae   : > { %p1912_p11 = scmp.ne.s32.totalorder %s2711_s12, %s1911_s25  ;;  %s1915_s29 = sshll.u32 %s1997_s28, 4  ;;  %s1916_s29 = int_to_ptr.vmem [resolvable:$false] %s1915_s29 }
 0x4af   : > { %s1917_s9 = scalar_lea.vmem %s1916_s29, 512  ;;  %p1918_p0 = scmp.lt.s32.totalorder %s2711_s12, %s1916_s29 }
 0x4b0   : > { %p1913_p12 = pnand %p1912_p11, %p2071_p5  ;;  %p1919_p1 = scmp.lt.s32.totalorder %s1917_s9, %s1911_s25 }
 0x4b2   : > { %p1914_p13 = pneg %p1913_p12  ;;  %p1920_p2 = por %p1919_p1, %p1918_p0 }
 0x4b4   : > { %p1921_p3 = pnand %p1920_p2, %p1914_p13 }
 0x4e9   : > { %v1176_v22 = vpop.permute.xlu0 %1175 }
 0x4eb   : > { %v1824_v32 = vpop.permute.xlu1 %1823 }
 0x4ec   : > { %v1826_v38 = vunpack.i.h.bf16 %v1824_v32  ;;  %v1825_v10 = vunpack.i.l.bf16 %v1824_v32 }
 0x4ed   : > { %v1208_v37 = vpop.permute.xlu0 %1207 }
 0x4ee   : > { %v1177_v56 = vsel %vm2849_vm11, %v1825_v10, %v1826_v38  ;;  %v1178_v2 = vsel %vm2850_vm5, %v1826_v38, %v1176_v22  ;;  %vm1319_vm11 = vcmask 1006592   ;;  %vm2858_vm5 = vcmask 1022976  }
 0x4ef   : > { %v1829_v47 = vpop.permute.xlu1 %1828  ;;  %v1181_v43 = vsel %vm2184_vm12, %v1177_v56, -inf  ;;  %v1182_v59 = vsel %vm2188_vm13, %v1178_v2, -inf  ;;  %vm2853_vm12 = vcmask 1031168   ;;  %vm2859_vm2 = vmmov %vm2858_vm5 }
 0x4f0   : > { %v1831_v57 = vunpack.i.h.bf16 %v1829_v47  ;;  %v1830_v58 = vunpack.i.l.bf16 %v1829_v47  ;;  %v1183_v1 = vmax.f32 %v2531_v6, %v1181_v43  ;;  %v1184_v21 = vmax.f32 %v2533_v52, %v1182_v59  ;;  %vm2854_vm13 = vmmov %vm2853_vm12 }
 0x4f1   : > { %v1222_v50 = vpop.permute.xlu0 %1221 }
 0x4f2   : > { %v1209_v61 = vsel %vm2851_vm7, %v1830_v58, %v1831_v57  ;;  %v1210_v16 = vsel %vm2852_vm6, %v1831_v57, %v1208_v37  ;;  %vm1346_vm7 = vcmask 39936   ;;  %vm2860_vm6 = vcmask 23552  }
 0x4f3   : > { %v1834_v11 = vpop.permute.xlu1 %1833  ;;  %v1213_v23 = vsel %vm2197_vm15, %v1209_v61, -inf  ;;  %v1214_v24 = vsel %vm2201_vm0, %v1210_v16, -inf  ;;  %vm1355_vm15 = vcmp.lt.s32.totalorder %v2567_v63, 10  ;;  %vm2857_vm0 = vnez %v2792_v55 }
 0x4f4   : > { %v1836_v62 = vunpack.i.h.bf16 %v1834_v11  ;;  %v1835_v4 = vunpack.i.l.bf16 %v1834_v11  ;;  %v1215_v22 = vmax.f32 %v1183_v1, %v1213_v23  ;;  %v1216_v32 = vmax.f32 %v1184_v21, %v1214_v24 }
 0x4f5   : > { %v1236_v3 = vpop.permute.xlu0 %1235 }
 0x4f6   : > { %v1223_v17 = vsel %vm2853_vm12, %v1835_v4, %v1836_v62  ;;  %v1224_v28 = vsel %vm2854_vm13, %v1836_v62, %v1222_v50  ;;  %vm2861_vm12 = vmmov %vm2860_vm6  ;;  %vm2624_vm13 = vcmp.eq.s32.totalorder %v1333_v48, 1 }
 0x4f7   : > { %v1839_v51 = vpop.permute.xlu1 %1838  ;;  %v1227_v37 = vsel %vm2211_vm8, %v1223_v17, -inf  ;;  %v1228_v47 = vsel %vm2857_vm0, %v1224_v28, -inf  ;;  %vm2608_vm8 = vcmp.eq.s32.totalorder %v1306_v39, 1  ;;  %vm2874_vm0 = vcmask 31744  }
 0x4f8   : > { %v1841_v15 = vunpack.i.h.bf16 %v1839_v51  ;;  %v1840_v18 = vunpack.i.l.bf16 %v1839_v51  ;;  %v1229_v8 = vmax.f32 %v1215_v22, %v1227_v37  ;;  %v1230_v57 = vmax.f32 %v1216_v32, %v1228_v47 }
 0x4f9   : > { %v1250_v53 = vpop.permute.xlu0 %1249 }
 0x4fa   : > { %v1237_v41 = vsel %vm2855_vm3, %v1840_v18, %v1841_v15  ;;  %v1238_v35 = vsel %vm2856_vm9, %v1841_v15, %v1236_v3  ;;  %vm2628_vm3 = vcmp.eq.s32.totalorder %v1337_v49, 1  ;;  %vm2870_vm9 = vnez %v2804_v33 }
 0x4fb   : > { %v1844_v14 = vpop.permute.xlu1 %1843  ;;  %v1241_v50 = vsel %vm2233_vm1, %v1237_v41, -inf  ;;  %v1242_v11 = vsel %vm2237_vm14, %v1238_v35, -inf  ;;  %vm2612_vm1 = vcmp.eq.s32.totalorder %v1310_v20, 1  ;;  %vm1382_vm14 = vcmp.ge.s32.totalorder %v2567_v63, 6 }
 0x4fc   : > { %v1846_v9 = vunpack.i.h.bf16 %v1844_v14  ;;  %v1845_v29 = vunpack.i.l.bf16 %v1844_v14  ;;  %v1243_v16 = vmax.f32 %v1229_v8, %v1241_v50  ;;  %v1244_v62 = vmax.f32 %v1230_v57, %v1242_v11 }
 0x4fd   : > { %v1264_v42 = vpop.permute.xlu0 %1263 }
 0x4fe   : > { %v1251_v3 = vsel %vm2858_vm5, %v1845_v29, %v1846_v9  ;;  %v1252_v38 = vsel %vm2859_vm2, %v1846_v9, %v1250_v53  ;;  %v1356_v53 = vsel %vm1355_vm15, 1, %v1975_v0  ;;  %vm2875_vm5 = vmmov %vm2874_vm0  ;;  %vm1373_vm2 = vcmask 998400  }
 0x4ff   : > { %v1849_v5 = vpop.permute.xlu1 %1848  ;;  %v1255_v14 = vsel %vm2356_vm4, %v1251_v3, -inf  ;;  %vm2871_vm4 = vnez %v2806_v44  ;;  %v1360_v21 = vrot.slane %v1356_v53, %v2169_v25  ;;  %v1364_v23 = vrot.slane %v1356_v53, %v2172_v26 }
 0x500   : > { %v1851_v6 = vunpack.i.h.bf16 %v1849_v5  ;;  %v1850_v46 = vunpack.i.l.bf16 %v1849_v5  ;;  %v1257_v20 = vmax.f32 %v1243_v16, %v1255_v14  ;;  %v1383_v44 = vsel %vm1382_vm14, 1, %v1975_v0 }
 0x501   : > { %v1278_v19 = vpop.permute.xlu0 %1277  ;;  %vm2879_vm14 = vnez %v2820_v34  ;;  %v1391_v47 = vrot.slane %v1383_v44, %v2172_v26  ;;  %v1387_v50 = vrot.slane %v1383_v44, %v2169_v25 }
 0x502   : > { %v1265_v51 = vsel %vm2860_vm6, %v1850_v46, %v1851_v6  ;;  %v1266_v54 = vsel %vm2861_vm12, %v1851_v6, %v1264_v42  ;;  %v1256_v42 = vsel %vm2364_vm10, %v1252_v38, -inf  ;;  %vm2872_vm10 = vcmask 1014784  }
 0x503   : > { %v1854_v31 = vpop.permute.xlu1 %1853  ;;  %v1269_v4 = vsel %vm2870_vm9, %v1265_v51, -inf  ;;  %v1270_v27 = vsel %vm2871_vm4, %v1266_v54, -inf  ;;  %vm2873_vm15 = vmmov %vm2872_vm10  ;;  %v1258_v40 = vmax.f32 %v1244_v62, %v1256_v42  ;;  %vm2876_vm6 = vnez %v2812_v12 }
 0x504   : > { %v1856_v56 = vunpack.i.h.bf16 %v1854_v31  ;;  %v1855_v2 = vunpack.i.l.bf16 %v1854_v31  ;;  %v1271_v17 = vmax.f32 %v1257_v20, %v1269_v4  ;;  %vm2877_vm12 = vnez %v2814_v13 }
 0x505   : > { %v1292_v52 = vpop.permute.xlu0 %1291  ;;  %vm2878_vm9 = vnez %v2818_v36  ;;  %vm2655_vm4 = vcmp.eq.s32.totalorder %v1360_v21, 1 }
 0x506   : > { %v1279_v5 = vsel %vm2872_vm10, %v1855_v2, %v1856_v56  ;;  %v1280_v15 = vsel %vm2873_vm15, %v1856_v56, %v1278_v19  ;;  %v1272_v19 = vmax.f32 %v1258_v40, %v1270_v27  ;;  %vm2659_vm10 = vcmp.eq.s32.totalorder %v1364_v23, 1  ;;  %v1513_v23 = vpop.f32.mrb[4].mxu0 }
 0x507   : > { %v1859_v10 = vpop.permute.xlu1 %1858  ;;  %v1283_v28 = vsel %vm2876_vm6, %v1279_v5, -inf  ;;  %v1284_v9 = vsel %vm2877_vm12, %v1280_v15, -inf  ;;  %v1520_v56 = vpack.c.bf16 %v2445_v45, %v2445_v45 }
 0x508   : > { %v1861_v43 = vunpack.i.h.bf16 %v1859_v10  ;;  %v1860_v59 = vunpack.i.l.bf16 %v1859_v10  ;;  %v1285_v13 = vmax.f32 %v1271_v17, %v1283_v28  ;;  %v1286_v48 = vmax.f32 %v1272_v19, %v1284_v9 }
 0x509   : > { %v1318_v58 = vpop.permute.xlu0 %1317 }
 0x50a   : > { %v1293_v33 = vsel %vm2874_vm0, %v1860_v59, %v1861_v43  ;;  %v1294_v24 = vsel %vm2875_vm5, %v1861_v43, %v1292_v52 }
 0x50b   : > { %v1864_v30 = vpop.permute.xlu1 %1863  ;;  %v1297_v46 = vsel %vm2878_vm9, %v1293_v33, -inf  ;;  %v1298_v63 = vsel %vm2879_vm14, %v1294_v24, -inf  ;;  %v1515_v33 = vpop.f32.mrb[5].mxu0 }
 0x50c   : > { %v1866_v18 = vunpack.i.h.bf16 %v1864_v30  ;;  %v1865_v39 = vunpack.i.l.bf16 %v1864_v30  ;;  %v1299_v11 = vmax.f32 %v1285_v13, %v1297_v46  ;;  %v1300_v3 = vmax.f32 %v1286_v48, %v1298_v63  ;;  %v1517_v24 = vpop.f32.mrb[6].mxu0 }
 0x50d   : > { %v1345_v1 = vpop.permute.xlu0 %1344  ;;  %v1518_v44 = vpop.f32.mrb[7].mxu0 }
 0x50e   : > { %v1320_v31 = vsel %vm1319_vm11, %v1865_v39, %v1866_v18  ;;  %v1321_v41 = vsel %vm1319_vm11, %v1866_v18, %v1318_v58  ;;  %vm1400_vm11 = vcmask 48128  }
 0x50f   : > { %v1869_v29 = vpop.permute.xlu1 %1868  ;;  %v1324_v36 = vsel %vm2608_vm8, %v1320_v31, -inf  ;;  %v1325_v34 = vsel %vm2612_vm1, %v1321_v41, -inf  ;;  %vm2687_vm8 = vcmp.eq.s32.totalorder %v1387_v50, 1  ;;  %vm2888_vm1 = vcmask 15360  }
 0x510   : > { %v1871_v35 = vunpack.i.h.bf16 %v1869_v29  ;;  %v1870_v6 = vunpack.i.l.bf16 %v1869_v29  ;;  %v1326_v2 = vmax.f32 %v1299_v11, %v1324_v36  ;;  %v1327_v55 = vmax.f32 %v1300_v3, %v1325_v34  ;;  %vm2892_vm0 = vmmov %vm2888_vm1 }
 0x511   : > { %v1372_v32 = vpop.permute.xlu0 %1371  ;;  %vm2893_vm5 = vmmov %vm2892_vm0 }
 0x512   : > { %v1347_v49 = vsel %vm1346_vm7, %v1870_v6, %v1871_v35  ;;  %v1348_v22 = vsel %vm1346_vm7, %v1871_v35, %v1345_v1  ;;  %vm2683_vm7 = vcmp.eq.s32.totalorder %v1391_v47, 1 }
 0x513   : > { %v1874_v37 = vpop.permute.xlu1 %1873  ;;  %v1351_v51 = vsel %vm2624_vm13, %v1347_v49, -inf  ;;  %v1352_v54 = vsel %vm2628_vm3, %v1348_v22, -inf  ;;  %vm2889_vm13 = vcmask 1040384  }
 0x514   : > { %v1876_v38 = vunpack.i.h.bf16 %v1874_v37  ;;  %v1875_v10 = vunpack.i.l.bf16 %v1874_v37  ;;  %v1353_v45 = vmax.f32 %v1326_v2, %v1351_v51  ;;  %v1354_v14 = vmax.f32 %v1327_v55, %v1352_v54  ;;  %vm2890_vm3 = vmmov %vm2889_vm13 }
 0x515   : > { %v1399_v59 = vpop.permute.xlu0 %1398  ;;  %v1528_v5 = vsel %vm2889_vm13, %v1520_v56, 0  ;;  %vm2891_vm15 = vmmov %vm2890_vm3 }
 0x516   : > { %v1374_v26 = vsel %vm1373_vm2, %v1875_v10, %v1876_v38  ;;  %v1375_v25 = vsel %vm1373_vm2, %v1876_v38, %v1372_v32 }
 0x517   : > { %v1378_v7 = vsel %vm2655_vm4, %v1374_v26, -inf  ;;  %v1379_v8 = vsel %vm2659_vm10, %v1375_v25, -inf  ;;  %v1879_v58 = vpop.permute.xlu1 %1878 }
 0x518   : > { %v1881_v42 = vunpack.i.h.bf16 %v1879_v58  ;;  %v1880_v43 = vunpack.i.l.bf16 %v1879_v58  ;;  %v1381_v60 = vmax.f32 %v1354_v14, %v1379_v8  ;;  %v1380_v62 = vmax.f32 %v1353_v45, %v1378_v7 }
 0x519   : > { %v1523_v1 = vpop.permute.xlu0 %1522 }
 0x51a   : > { %v1401_v61 = vsel %vm1400_vm11, %v1880_v43, %v1881_v42  ;;  %v1402_v16 = vsel %vm1400_vm11, %v1881_v42, %v1399_v59 }
 0x51b   : > { %v1406_v4 = vsel %vm2683_vm7, %v1402_v16, -inf  ;;  %v1418_v27 = vpop.permute.xlu1 %1417  ;;  %v1405_v30 = vsel %vm2687_vm8, %v1401_v61, -inf }
 0x51c   : > { %1746 = vmatmul.mubr.msk.bf16.vlgmr.msra.gmra.mrb[0].mxu1 %vm2888_vm1, %v1418_v27  ;;  %v1408_v15 = vmax.f32 %v1381_v60, %v1406_v4  ;;  %v1407_v18 = vmax.f32 %v1380_v62, %v1405_v30 }
 0x51d   : > { %1534 = vmatpush1.bf16.msra.mxu1 %v1528_v5  ;;  %1565 = vmatprep.mubr.bf16.mxu1 %v1975_v0 }
 0x51e   : > { %v1577_v39 = vpack.c.bf16 %v1408_v15, %v1408_v15  ;;  %v1576_v20 = vpack.c.bf16 %v1407_v18, %v1407_v18 }
 0x51f   : > { %v1579_v21 = vpop.permute.xlu1 %1578 }
 0x520   : > { %1751 = vmatprep.subr.msk.bf16.mxu0 %vm2890_vm3, %v1577_v39  ;;  %v1584_v40 = vsel %vm2891_vm15, %v1576_v20, 0 }
 0x521   : > { %1590 = vmatpush1.bf16.msra.mxu0 %v1584_v40 }
 0x524   : > { %1750 = vmatmul.mubr.msk.bf16.vlgmr.msra.gmra.mrb[4].mxu1 %vm2892_vm0, %v1523_v1  ;;  %1752 = vmatmul.mubr.msk.bf16.vlgmr.msra.gmra.mrb[8].mxu0 %vm2893_vm5, %v1579_v21 }
 0x52a   : > { %v1636_v22 = vpop.permute.xlu0 %1635 }
 0x5ef   : > { %v1463_v17 = vpop.f32.mrb[0].mxu1 }
 0x5f0   : > { %v1465_v19 = vpop.f32.mrb[1].mxu1  ;;  %v1514_v0 = vadd.f32 %v1513_v23, %v1463_v17 }
 0x5f1   : > { %v1467_v28 = vpop.f32.mrb[2].mxu1  ;;  %v1516_v9 = vadd.f32 %v1515_v33, %v1465_v19 }
 0x5f2   : > { %v1468_v29 = vpop.f32.mrb[3].mxu1 }
 0x5f7   : > { %v1567_v31 = vpop.f32.mrb[4].mxu1  ;;  %v1623_v41 = vpop.f32.mrb[8].mxu0 }
 0x5f8   : > { %v1574_v35 = vadd.f32 %v1567_v31, %v1514_v0  ;;  %v1569_v6 = vpop.f32.mrb[5].mxu1  ;;  %v1625_v46 = vpop.f32.mrb[9].mxu0 }
 0x5f9   : > { %v1575_v63 = vadd.f32 %v1569_v6, %v1516_v9  ;;  %v1571_v52 = vpop.f32.mrb[6].mxu1  ;;  %v1627_v12 = vpop.f32.mrb[10].mxu0 }
 0x5fa   : > { %v1630_v13 = vadd.f32 %v1623_v41, %v1574_v35  ;;  %v1572_v48 = vpop.f32.mrb[7].mxu1  ;;  %v1628_v49 = vpop.f32.mrb[11].mxu0 }
 0x5fb   : > { %v1631_v36 = vadd.f32 %v1625_v46, %v1575_v63 }
 0x5fc   : > { %v1638_v34 = vadd.f32 %v1636_v22, %v1630_v13 }
 0x5fd   : > { %v1639_v32 = vadd.f32 %v1636_v22, %v1631_v36 }
 0x5fe   : > { %v1640_v37 = vsub.f32 0.0, %v1638_v34 }
 0x5ff   : > { %v1641_v47 = vsub.f32 0.0, %v1639_v32 }
 0x600   : > { %v1642_v50 = vmul.f32 1.442695, %v1640_v37 }
 0x601   : > { %v1644_v11 = vmul.f32 1.442695, %v1641_v47 }
 0x602   : > { %1902 = vpow2.f32 %v1642_v50 }
 0x603   : > { %1904 = vpow2.f32 %v1644_v11 }
 0x60c   : > { %v1903_v3 = vpop.eup %1902 }
 0x60d   : > { %v1905_v38 = vpop.eup %1904  ;;  %v1646_v10 = vadd.f32 1.0, %v1903_v3 }
 0x60e   : > { %v1647_v51 = vadd.f32 1.0, %v1905_v38 }
 0x60f   : > { %1906 = vrcp.f32 %v1646_v10 }
 0x610   : > { %1908 = vrcp.f32 %v1647_v51 }
 0x619   : > { %v1907_v54 = vpop.eup %1906 }
 0x61a   : > { %v1909_v56 = vpop.eup %1908  ;;  %v1650_v2 = vmul.f32 %v1907_v54, %v1638_v34 }
 0x61b   : > { %v1651_v55 = vmul.f32 %v1909_v56, %v1639_v32 }
 0x61c   : > { %1652 = vst [vmem:[%s244_s11] sm:$0xff] %v1650_v2 }
 0x61d   : > { %1653 = vst [vmem:[%s244_s11 + $0x8] sm:$0xff] %v1651_v55 }
 0x61e   : > { %1924 = shalt.err (!%p1921_p3)
}
 0x61f   : > { %s1925_s13 = scalar_lea.hbm %s2709_s18, 256  ;;  %s1929_s10 = scalar_lea.hbm %s2757_s6, 512 }
 0x620   : > { %p1926_p4 = scmp.ne.s32.totalorder %s2709_s18, %s1925_s13  ;;  %p1930_p9 = scmp.lt.u32.totalorder %s2709_s18, %s2757_s6 }
 0x621   : > { %p1931_p10 = scmp.lt.u32.totalorder %s1929_s10, %s1925_s13  ;;  %p1933_p12 = scmp.lt.u32.totalorder %s1925_s13, %s2709_s18 }
 0x622   : > { %p1927_p7 = pnand %p1926_p4, %p2071_p5 }
 0x623   : > { %p1932_p11 = por %p1931_p10, %p1930_p9 }
 0x624   : > { %p1928_p8 = pneg %p1927_p7 }
 0x625   : > { %p1934_p13 = por %p1933_p12, %p1932_p11 }
 0x627   : > { %p1935_p0 = pnand %p1934_p13, %p1928_p8 }
 0x629   : > { %1938 = shalt.err (!%p1935_p0)
}
 0x62a   : > { %1760 = dma.vmem_to_hbm [thread:$0]  (%p2071_p5), %s2711_s12, 256, %s2709_s18, %s1655_s26  }
 0x62b PF: > { %p1766_p1 = scmp.ge.s32.totalorder %s1973_s24, 2  ;;  %s1681_s11 = sand.u32 1, %s1961_s21  }
 0x62c   : > { %s1682_s19 = scalar_lea.sflag [#allocation4], %s1681_s11 }
 0x62d   : > { %p1763_p2 = pnand %p1766_p1, %p2075_p6 }
 0x62f   : > { %1956 = dma.done.wait (!%p1763_p2), %s1682_s19, 256  }
 0x630   : > { %1958 = vsyncadd (!%p1763_p2), %s1682_s19, 4294967040  ;;  %p16_p3 = scmp.ge.s32.totalorder %s2058_s27, 4   ;;  %s2894_s21 = smov %s1965_s22 }
 0x631   : > { %s2895_s22 = smov %s1969_s23  ;;  %s2896_s23 = smov %s2069_s30 }
 0x632   : > { %s2897_s24 = smov %s2058_s27  ;;  %18 = sbr.rel (!%p16_p3) target bundleno = 3 (0x3), region = 79 }
 0x639   :  { %1687 = vsyncpa [#allocation4], 1 }
 0x63a   :  { %1689 = vsyncpa [#allocation4 + $0x1], 1 }

</bundles_post_ra>
